<compile_context>
chip_gen: v5e
topology: v5e:2x2
jax: 0.10.0
libtpu: 0.0.40
codegen_flags: <defaults>
</compile_context>

<pallas_src>
import functools

import numpy as np
import jax
import jax.numpy as jnp
from jax.experimental import pallas as pl
from jax.experimental.pallas import tpu as pltpu

# Logical (PyTorch) dimensions
D_IN = 28 * 28     # 784
D_HID = 400
D_OUT = 10


def _round_up(x, m):
    return (x + m - 1) // m * m


# Lane-dense padded feature dimensions (multiples of 128) for everything
# *after* the first matmul.  The input feature dim stays at 784 (unpadded K).
D_HID_P = _round_up(D_HID, 128)  # 512
D_OUT_P = _round_up(D_OUT, 128)  # 128


# ---------------------------------------------------------------------------
# Fused MLP kernel: x @ W1 + b1 -> ReLU -> @ W2 + b2 -> ReLU -> @ W3 + b3
#                   -> masked log_softmax (padding lanes excluded)
# ---------------------------------------------------------------------------
def mlp_kernel(x_ref, w1_ref, b1_ref, w2_ref, b2_ref, w3_ref, b3_ref, o_ref,
               *, num_classes):
    # fc1 + ReLU: cast the raw f32 pixels to bf16 in-kernel (no wrapper pad /
    # cast, no extra HBM traffic); f32 accumulation on the MXU.
    x = x_ref[...].astype(jnp.bfloat16)
    h = jnp.dot(x, w1_ref[...], preferred_element_type=jnp.float32)
    h = jnp.maximum(h + b1_ref[...], 0.0)

    # fc2 + ReLU (bf16 operands, f32 accumulation)
    h = jnp.dot(h.astype(jnp.bfloat16), w2_ref[...],
                preferred_element_type=jnp.float32)
    h = jnp.maximum(h + b2_ref[...], 0.0)

    # fc3 in f32 (512x128 is tiny) -> logits, lane-padded to 128
    logits = jnp.dot(h, w3_ref[...],
                     preferred_element_type=jnp.float32) + b3_ref[...]

    # log_softmax over the first `num_classes` lanes only
    lane = jax.lax.broadcasted_iota(jnp.int32, logits.shape, 1)
    valid = lane < num_classes
    masked = jnp.where(valid, logits, jnp.float32(-1e30))
    m = jnp.max(masked, axis=-1, keepdims=True)
    z = logits - m
    ez = jnp.where(valid, jnp.exp(z), 0.0)
    lse = jnp.log(jnp.sum(ez, axis=-1, keepdims=True))
    o_ref[...] = jnp.where(valid, z - lse, 0.0)


# ---------------------------------------------------------------------------
# Batch tiling policy (fixed tile + cdiv grid)
# ---------------------------------------------------------------------------
def _batch_tiling(B):
    """Return (tile_rows, grid_steps).

    Tile is capped at 512 rows so double-buffered x/out tiles + resident
    weights + intermediates fit comfortably inside v7x's 64 MiB VMEM, and we
    aim for >=2 grid steps once the batch is big enough so both v7x
    TensorCores (and the DMA/compute pipeline) have work.
    """
    if B <= 32:
        tb = max(_round_up(B, 16), 16)              # tiny batch: one aligned block
    else:
        tb = min(512, _round_up(pl.cdiv(B, 2), 16))  # >=2 steps, capped at 512
    grid = pl.cdiv(B, tb)
    return tb, grid


# ---------------------------------------------------------------------------
# Wrapper
# ---------------------------------------------------------------------------
def mlp_mnist_forward(params, x):
    """params: prepped weights (see prep_params). x: any shape, 784 feats/row."""
    w1, b1, w2, b2, w3, b3 = (params['w1'], params['b1'], params['w2'],
                              params['b2'], params['w3'], params['b3'])

    xf = x.reshape(-1, D_IN).astype(jnp.float32)    # x.view(-1, 784); f32, unpadded
    B = xf.shape[0]

    tb, grid = _batch_tiling(B)
    Bp = tb * grid
    if Bp != B:
        # Batch-only zero-pad (rare; zero cost when B is a tile multiple).
        xf = jnp.pad(xf, ((0, Bp - B), (0, 0)))

    full = lambda i: (0, 0)
    kernel = functools.partial(mlp_kernel, num_classes=D_OUT)

    # Advisory cost estimate so XLA schedules surrounding ops around the call.
    flops = 2 * Bp * (D_IN * D_HID_P + D_HID_P * D_HID_P + D_HID_P * D_OUT_P)
    weight_bytes = sum(int(p.size) * p.dtype.itemsize
                       for p in (w1, b1, w2, b2, w3, b3))
    cost = pl.CostEstimate(
        flops=flops,
        transcendentals=Bp * D_OUT_P,
        bytes_accessed=int(Bp * D_IN * 4 + Bp * D_OUT_P * 4 + weight_bytes))

    out = pl.pallas_call(
        kernel,
        out_shape=jax.ShapeDtypeStruct((Bp, D_OUT_P), jnp.float32),
        grid_spec=pltpu.PrefetchScalarGridSpec(
            num_scalar_prefetch=0,
            grid=(grid,),
            in_specs=[
                pl.BlockSpec((tb, D_IN), lambda i: (i, 0)),      # x tile (raw f32, K=784)
                pl.BlockSpec((D_IN, D_HID_P), full),             # W1 (bf16)
                pl.BlockSpec((1, D_HID_P), full),                # b1 (f32)
                pl.BlockSpec((D_HID_P, D_HID_P), full),          # W2 (bf16)
                pl.BlockSpec((1, D_HID_P), full),                # b2 (f32)
                pl.BlockSpec((D_HID_P, D_OUT_P), full),          # W3 (f32)
                pl.BlockSpec((1, D_OUT_P), full),                # b3 (f32)
            ],
            out_specs=pl.BlockSpec((tb, D_OUT_P), lambda i: (i, 0)),
        ),
        compiler_params=pltpu.CompilerParams(
            dimension_semantics=("parallel",)),
        cost_estimate=cost,
    )(xf, w1, b1, w2, b2, w3, b3)

    return out[:B, :D_OUT]


# ---------------------------------------------------------------------------
# Parameters (PyTorch nn.Linear-style uniform init, deterministic)
# ---------------------------------------------------------------------------
def init_raw_params(key):
    def linear(k, fan_in, fan_out):
        kw, kb = jax.random.split(k)
        bound = 1.0 / np.sqrt(fan_in)
        w = jax.random.uniform(kw, (fan_in, fan_out), jnp.float32, -bound, bound)
        b = jax.random.uniform(kb, (fan_out,), jnp.float32, -bound, bound)
        return w, b

    k1, k2, k3 = jax.random.split(key, 3)
    return [linear(k1, D_IN, D_HID),
            linear(k2, D_HID, D_HID),
            linear(k3, D_HID, D_OUT)]


def prep_params(raw):
    """Pad output feature dims to lane-dense widths.

    W1 keeps K=784 unpadded (same number of MXU K-passes as 896).  W1/W2 are
    bf16 MXU operands; W3 and all biases stay f32 (fc3 runs in f32).
    """
    (w1, b1), (w2, b2), (w3, b3) = raw
    w1p = jnp.zeros((D_IN, D_HID_P), jnp.float32).at[:, :D_HID].set(w1)
    b1p = jnp.zeros((1, D_HID_P), jnp.float32).at[0, :D_HID].set(b1)
    w2p = jnp.zeros((D_HID_P, D_HID_P), jnp.float32).at[:D_HID, :D_HID].set(w2)
    b2p = jnp.zeros((1, D_HID_P), jnp.float32).at[0, :D_HID].set(b2)
    w3p = jnp.zeros((D_HID_P, D_OUT_P), jnp.float32).at[:D_HID, :D_OUT].set(w3)
    b3p = jnp.zeros((1, D_OUT_P), jnp.float32).at[0, :D_OUT].set(b3)
    return {'w1': w1p.astype(jnp.bfloat16), 'b1': b1p,
            'w2': w2p.astype(jnp.bfloat16), 'b2': b2p,
            'w3': w3p, 'b3': b3p}


def mlp_mnist_reference(raw, x):
    """Pure-JAX f32 reference matching the PyTorch forward."""
    (w1, b1), (w2, b2), (w3, b3) = raw
    h = x.reshape(-1, D_IN).astype(jnp.float32)
    h = jnp.maximum(h @ w1 + b1, 0.0)
    h = jnp.maximum(h @ w2 + b2, 0.0)
    logits = h @ w3 + b3
    return jax.nn.log_softmax(logits, axis=-1)


if __name__ == "__main__":
    key = jax.random.PRNGKey(0)
    pkey, xkey = jax.random.split(key)
    raw = init_raw_params(pkey)
    params = prep_params(raw)

    # MNIST-like input; forward flattens to (-1, 784) exactly like x.view(-1, 28*28)
    x = jax.random.normal(xkey, (2, 1, 28, 28), jnp.float32)

    fwd = jax.jit(mlp_mnist_forward)
    out = jax.block_until_ready(fwd(params, x))

    assert out.shape == (2, D_OUT), out.shape
    assert bool(jnp.all(jnp.isfinite(out)))
    # log_softmax rows must exp-sum to 1
    assert bool(jnp.all(jnp.abs(jnp.sum(jnp.exp(out), axis=-1) - 1.0) < 1e-4))
    # compare against f32 reference (tolerance covers bf16 fc1/fc2 operands)
    ref = mlp_mnist_reference(raw, x)
    assert float(jnp.max(jnp.abs(out - ref))) < 0.1

    print("KERNEL_OK")
</pallas_src>

<mosaic_0001>
module attributes {stable_mosaic.version = 11 : i64} {
  func.func @mlp_kernel(%arg0: i32, %arg1: memref<16x784xf32, #tpu.memory_space<vmem>>, %arg2: memref<784x512xbf16, #tpu.memory_space<vmem>>, %arg3: memref<1x512xf32, #tpu.memory_space<vmem>>, %arg4: memref<512x512xbf16, #tpu.memory_space<vmem>>, %arg5: memref<1x512xf32, #tpu.memory_space<vmem>>, %arg6: memref<512x128xf32, #tpu.memory_space<vmem>>, %arg7: memref<1x128xf32, #tpu.memory_space<vmem>>, %arg8: memref<16x128xf32, #tpu.memory_space<vmem>>) attributes {dimension_semantics = [#tpu.dimension_semantics<parallel>], iteration_bounds = array<i64: 1>, scalar_prefetch = 0 : i64, scratch_operands = 0 : i64, tpu.core_type = #tpu.core_type<tc>, window_params = [{transform_indices = @transform_0, window_bounds = array<i64: 16, 784>}, {pipeline_mode = #tpu.pipeline_mode<synchronous>, transform_indices = @transform_1, window_bounds = array<i64: 784, 512>}, {pipeline_mode = #tpu.pipeline_mode<synchronous>, transform_indices = @transform_2, window_bounds = array<i64: 1, 512>}, {pipeline_mode = #tpu.pipeline_mode<synchronous>, transform_indices = @transform_3, window_bounds = array<i64: 512, 512>}, {pipeline_mode = #tpu.pipeline_mode<synchronous>, transform_indices = @transform_4, window_bounds = array<i64: 1, 512>}, {pipeline_mode = #tpu.pipeline_mode<synchronous>, transform_indices = @transform_5, window_bounds = array<i64: 512, 128>}, {pipeline_mode = #tpu.pipeline_mode<synchronous>, transform_indices = @transform_6, window_bounds = array<i64: 1, 128>}, {transform_indices = @transform_7, window_bounds = array<i64: 16, 128>}]} {
    %c0 = arith.constant 0 : index
    %c0_0 = arith.constant 0 : index
    %0 = vector.load %arg1[%c0, %c0_0] : memref<16x784xf32, #tpu.memory_space<vmem>>, vector<16x784xf32>
    %1 = arith.truncf %0 : vector<16x784xf32> to vector<16x784xbf16>
    %c0_1 = arith.constant 0 : index
    %c0_2 = arith.constant 0 : index
    %2 = vector.load %arg2[%c0_1, %c0_2] : memref<784x512xbf16, #tpu.memory_space<vmem>>, vector<784x512xbf16>
    %cst = arith.constant dense<0.000000e+00> : vector<16x512xf32>
    %3 = tpu.matmul %1, %2, %cst {dimension_numbers = #tpu.dot_dimension_numbers<[1], [0], [0], [1], [0, 0, 1, 1], [], []>} : vector<16x784xbf16>, vector<784x512xbf16>, vector<16x512xf32> -> vector<16x512xf32>
    %c0_3 = arith.constant 0 : index
    %c0_4 = arith.constant 0 : index
    %4 = vector.load %arg3[%c0_3, %c0_4] : memref<1x512xf32, #tpu.memory_space<vmem>>, vector<1x512xf32>
    %5 = vector.broadcast %4 : vector<1x512xf32> to vector<16x512xf32>
    %6 = arith.addf %3, %5 : vector<16x512xf32>
    %cst_5 = arith.constant 0.000000e+00 : f32
    %7 = vector.broadcast %cst_5 : f32 to vector<16x512xf32>
    %8 = arith.maximumf %6, %7 : vector<16x512xf32>
    %9 = arith.truncf %8 : vector<16x512xf32> to vector<16x512xbf16>
    %c0_6 = arith.constant 0 : index
    %c0_7 = arith.constant 0 : index
    %10 = vector.load %arg4[%c0_6, %c0_7] : memref<512x512xbf16, #tpu.memory_space<vmem>>, vector<512x512xbf16>
    %cst_8 = arith.constant dense<0.000000e+00> : vector<16x512xf32>
    %11 = tpu.matmul %9, %10, %cst_8 {dimension_numbers = #tpu.dot_dimension_numbers<[1], [0], [0], [1], [0, 0, 1, 1], [], []>} : vector<16x512xbf16>, vector<512x512xbf16>, vector<16x512xf32> -> vector<16x512xf32>
    %c0_9 = arith.constant 0 : index
    %c0_10 = arith.constant 0 : index
    %12 = vector.load %arg5[%c0_9, %c0_10] : memref<1x512xf32, #tpu.memory_space<vmem>>, vector<1x512xf32>
    %13 = vector.broadcast %12 : vector<1x512xf32> to vector<16x512xf32>
    %14 = arith.addf %11, %13 : vector<16x512xf32>
    %cst_11 = arith.constant 0.000000e+00 : f32
    %15 = vector.broadcast %cst_11 : f32 to vector<16x512xf32>
    %16 = arith.maximumf %14, %15 : vector<16x512xf32>
    %c0_12 = arith.constant 0 : index
    %c0_13 = arith.constant 0 : index
    %17 = vector.load %arg6[%c0_12, %c0_13] : memref<512x128xf32, #tpu.memory_space<vmem>>, vector<512x128xf32>
    %cst_14 = arith.constant dense<0.000000e+00> : vector<16x128xf32>
    %18 = tpu.matmul %16, %17, %cst_14 {dimension_numbers = #tpu.dot_dimension_numbers<[1], [0], [0], [1], [0, 0, 1, 1], [], []>} : vector<16x512xf32>, vector<512x128xf32>, vector<16x128xf32> -> vector<16x128xf32>
    %c0_15 = arith.constant 0 : index
    %c0_16 = arith.constant 0 : index
    %19 = vector.load %arg7[%c0_15, %c0_16] : memref<1x128xf32, #tpu.memory_space<vmem>>, vector<1x128xf32>
    %20 = vector.broadcast %19 : vector<1x128xf32> to vector<16x128xf32>
    %21 = arith.addf %18, %20 : vector<16x128xf32>
    %22 = tpu.iota {dimensions = array<i32: 1>} : vector<16x128xi32>
    %c10_i32 = arith.constant 10 : i32
    %23 = vector.broadcast %c10_i32 : i32 to vector<16x128xi32>
    %24 = arith.cmpi slt, %22, %23 : vector<16x128xi32>
    %cst_17 = arith.constant -1.000000e+30 : f32
    %25 = vector.broadcast %cst_17 : f32 to vector<16x128xf32>
    %26 = arith.select %24, %21, %25 : vector<16x128xi1>, vector<16x128xf32>
    %cst_18 = arith.constant dense<0xFF800000> : vector<16xf32>
    %27 = vector.multi_reduction <maximumf>, %26, %cst_18 [1] : vector<16x128xf32> to vector<16xf32>
    %28 = vector.shape_cast %27 : vector<16xf32> to vector<16x1xf32>
    %29 = vector.broadcast %28 : vector<16x1xf32> to vector<16x128xf32>
    %30 = arith.subf %21, %29 : vector<16x128xf32>
    %31 = math.exp %30 : vector<16x128xf32>
    %cst_19 = arith.constant 0.000000e+00 : f32
    %32 = vector.broadcast %cst_19 : f32 to vector<16x128xf32>
    %33 = arith.select %24, %31, %32 : vector<16x128xi1>, vector<16x128xf32>
    %cst_20 = arith.constant dense<0.000000e+00> : vector<16xf32>
    %34 = vector.multi_reduction <add>, %33, %cst_20 [1] : vector<16x128xf32> to vector<16xf32>
    %35 = vector.shape_cast %34 : vector<16xf32> to vector<16x1xf32>
    %36 = math.log %35 : vector<16x1xf32>
    %37 = vector.broadcast %36 : vector<16x1xf32> to vector<16x128xf32>
    %38 = arith.subf %30, %37 : vector<16x128xf32>
    %cst_21 = arith.constant 0.000000e+00 : f32
    %39 = vector.broadcast %cst_21 : f32 to vector<16x128xf32>
    %40 = arith.select %24, %38, %39 : vector<16x128xi1>, vector<16x128xf32>
    %c0_22 = arith.constant 0 : index
    %c0_23 = arith.constant 0 : index
    %41 = vector.load %arg8[%c0_22, %c0_23] : memref<16x128xf32, #tpu.memory_space<vmem>>, vector<16x128xf32>
    tpu.vector_store %arg8[%c0_22, %c0_23], %40 {strides = array<i32>} : memref<16x128xf32, #tpu.memory_space<vmem>>, vector<16x128xf32>,
    return
  }
  func.func @transform_0(%arg0: i32) -> (i32, i32) {
    %c0_i32 = arith.constant 0 : i32
    %c0_i32_0 = arith.constant 0 : i32
    return %arg0, %c0_i32 : i32, i32
  }
  func.func @transform_1(%arg0: i32) -> (i32, i32) {
    %c0_i32 = arith.constant 0 : i32
    %c0_i32_0 = arith.constant 0 : i32
    %c0_i32_1 = arith.constant 0 : i32
    return %c0_i32, %c0_i32_0 : i32, i32
  }
  func.func @transform_2(%arg0: i32) -> (i32, i32) {
    %c0_i32 = arith.constant 0 : i32
    %c0_i32_0 = arith.constant 0 : i32
    %c0_i32_1 = arith.constant 0 : i32
    return %c0_i32, %c0_i32_0 : i32, i32
  }
  func.func @transform_3(%arg0: i32) -> (i32, i32) {
    %c0_i32 = arith.constant 0 : i32
    %c0_i32_0 = arith.constant 0 : i32
    %c0_i32_1 = arith.constant 0 : i32
    return %c0_i32, %c0_i32_0 : i32, i32
  }
  func.func @transform_4(%arg0: i32) -> (i32, i32) {
    %c0_i32 = arith.constant 0 : i32
    %c0_i32_0 = arith.constant 0 : i32
    %c0_i32_1 = arith.constant 0 : i32
    return %c0_i32, %c0_i32_0 : i32, i32
  }
  func.func @transform_5(%arg0: i32) -> (i32, i32) {
    %c0_i32 = arith.constant 0 : i32
    %c0_i32_0 = arith.constant 0 : i32
    %c0_i32_1 = arith.constant 0 : i32
    return %c0_i32, %c0_i32_0 : i32, i32
  }
  func.func @transform_6(%arg0: i32) -> (i32, i32) {
    %c0_i32 = arith.constant 0 : i32
    %c0_i32_0 = arith.constant 0 : i32
    %c0_i32_1 = arith.constant 0 : i32
    return %c0_i32, %c0_i32_0 : i32, i32
  }
  func.func @transform_7(%arg0: i32) -> (i32, i32) {
    %c0_i32 = arith.constant 0 : i32
    %c0_i32_0 = arith.constant 0 : i32
    return %arg0, %c0_i32 : i32, i32
  }
}

</mosaic_0001>

<bundles_post_ra>
// kernel: mlp_mnist_forward.1
= control target key start
LH: loop header
LB: loop body
LE: loop exit
PB: predicated region body
PF: predicated region fallthrough
CT: control target
= control target key end

     0   :  { %12 = vsyncpa [#allocation3], 0  ;;  %s4834_s0 = inlined_call_operand.vmem [shape: f32[16,784], index: 0, kind: input, shape index: {}]   ;;  %s4835_s1 = inlined_call_operand.hbm [shape: bf16[784,512], index: 1, kind: input, shape index: {}]   ;;  %s4836_s2 = inlined_call_operand.vmem [shape: f32[1,512], index: 2, kind: input, shape index: {}]   ;;  %s4837_s3 = inlined_call_operand.hbm [shape: bf16[512,512], index: 3, kind: input, shape index: {}]   ;;  %s4838_s4 = inlined_call_operand.vmem [shape: f32[1,512], index: 4, kind: input, shape index: {}]   ;;  %s4839_s5 = inlined_call_operand.hbm [shape: f32[512,128], index: 5, kind: input, shape index: {}]   ;;  %s4840_s6 = inlined_call_operand.vmem [shape: f32[1,128], index: 6, kind: input, shape index: {}]   ;;  %s4841_s7 = inlined_call_operand.vmem [shape: f32[16,128], index: 7, kind: output, shape index: {}]  }
   0x1   :  { %13 = vsyncpa [#allocation5], 0  ;;  %s35_s26 = sshll.u32 %s4837_s3, 4  ;;  %s4612_s27 = smov [#allocation4]   ;;  %s36_s26 = int_to_ptr.hbm [resolvable:$true] %s35_s26 }
   0x2   :  { %s37_s28 = sshll.u32 %s4612_s27, 4  ;;  %s20_s8 = sshll.u32 %s4835_s1, 4  ;;  %s38_s28 = int_to_ptr.vmem [resolvable:$true] %s37_s28  ;;  %s21_s8 = int_to_ptr.hbm [resolvable:$true] %s20_s8 }
   0x3   :  { %s4613_s9 = smov 256   ;;  %s4614_s10 = smov 16  }
   0x4   :  { %43 = dma.hbm_to_vmem [thread:$0]  %s36_s26, 16384, %s38_s28, [#allocation5], %s4613_s9, %s4613_s9, %s4614_s10  }
   0x5   :  { %s4615_s11 = smov [#allocation2]   ;;  %s50_s15 = sshll.u32 %s4839_s5, 4  ;;  %s51_s15 = int_to_ptr.hbm [resolvable:$true] %s50_s15 }
   0x6   :  { %s22_s12 = sshll.u32 %s4615_s11, 4  ;;  %s4616_s3 = smov [#allocation6]   ;;  %s23_s12 = int_to_ptr.vmem [resolvable:$true] %s22_s12 }
   0x7   :  { %28 = dma.hbm_to_vmem [thread:$0]  %s21_s8, 25088, %s23_s12, [#allocation3], %s4613_s9, %s4613_s9, %s4614_s10  }
   0x8   :  { %s52_s16 = sshll.u32 %s4616_s3, 4  ;;  %s4617_s17 = smov 128   ;;  %s53_s16 = int_to_ptr.vmem [resolvable:$true] %s52_s16 }
   0x9   :  { %s4618_s18 = smov 8  }
   0xa   :  { %58 = dma.hbm_to_vmem [thread:$0]  %s51_s15, 8192, %s53_s16, [#allocation5], %s4617_s17, %s4617_s17, %s4618_s18  }
   0xb   :  { %4608 = dma.done.wait [#allocation3], 25088  }
   0xc   :  { %4609 = vsyncadd [#allocation3], 4294942208 }
   0xd   :  { %4610 = dma.done.wait [#allocation5], 24576  }
   0xe   :  { %4611 = vsyncadd [#allocation5], 4294942720  ;;  %v3010_v0 = vld [vmem:[#allocation2 + $0xe0] sm:$0xf]  ;;  %v4226_v1 = vld [vmem:[#allocation2 + $0xec] sm:$0xf0] }
   0xf   :  { %v3138_v2 = vld [vmem:[#allocation2 + $0x1e0] sm:$0xf]  ;;  %v3011_v3 = vor.u32 %v4226_v1, %v3010_v0  ;;  %v4258_v4 = vld [vmem:[#allocation2 + $0x1ec] sm:$0xf0]  ;;  %vm1281_vm0 = vcmask 130048  }
  0x10   :  { %v3266_v5 = vld [vmem:[#allocation2 + $0x2e0] sm:$0xf]  ;;  %v4290_v6 = vld [vmem:[#allocation2 + $0x2ec] sm:$0xf0]  ;;  %v3139_v7 = vor.u32 %v4258_v4, %v3138_v2 }
  0x11   :  { %v3267_v8 = vor.u32 %v4290_v6, %v3266_v5  ;;  %v3394_v9 = vld [vmem:[#allocation2 + $0x3e0] sm:$0xf]  ;;  %v4322_v10 = vld [vmem:[#allocation2 + $0x3ec] sm:$0xf0]  ;;  %1285 = vmatpush.bf16.msra.mxu0 %v3011_v3 }
  0x12   :  { %v2994_v11 = vld [vmem:[#allocation2 + $0xc0] sm:$0xf]  ;;  %v3395_v12 = vor.u32 %v4322_v10, %v3394_v9  ;;  %v4222_v13 = vld [vmem:[#allocation2 + $0xcc] sm:$0xf0]  ;;  %1299 = vmatpush.bf16.msra.mxu1 %v3139_v7 }
  0x13   :  { %v3122_v14 = vld [vmem:[#allocation2 + $0x1c0] sm:$0xf]  ;;  %v4254_v15 = vld [vmem:[#allocation2 + $0x1cc] sm:$0xf0]  ;;  %1313 = vmatpush.bf16.msra.mxu2 %v3267_v8  ;;  %v2995_v16 = vor.u32 %v4222_v13, %v2994_v11 }
  0x14   :  { %v3123_v17 = vor.u32 %v4254_v15, %v3122_v14  ;;  %v3250_v18 = vld [vmem:[#allocation2 + $0x2c0] sm:$0xf]  ;;  %v4286_v19 = vld [vmem:[#allocation2 + $0x2cc] sm:$0xf0]  ;;  %1327 = vmatpush.bf16.msra.mxu3 %v3395_v12 }
  0x15   :  { %v3378_v20 = vld [vmem:[#allocation2 + $0x3c0] sm:$0xf]  ;;  %v3251_v21 = vor.u32 %v4286_v19, %v3250_v18  ;;  %v4318_v22 = vld [vmem:[#allocation2 + $0x3cc] sm:$0xf0]  ;;  %1286 = vmatpush.bf16.msra.mxu0 %v2995_v16 }
  0x16   :  { %v2978_v23 = vld [vmem:[#allocation2 + $0xa0] sm:$0xf]  ;;  %v4218_v24 = vld [vmem:[#allocation2 + $0xac] sm:$0xf0]  ;;  %v3379_v25 = vor.u32 %v4318_v22, %v3378_v20  ;;  %1300 = vmatpush.bf16.msra.mxu1 %v3123_v17 }
  0x17   :  { %v3106_v26 = vld [vmem:[#allocation2 + $0x1a0] sm:$0xf]  ;;  %v4250_v27 = vld [vmem:[#allocation2 + $0x1ac] sm:$0xf0]  ;;  %v2979_v29 = vor.u32 %v4218_v24, %v2978_v23  ;;  %1314 = vmatpush.bf16.msra.mxu2 %v3251_v21 }
  0x18   :  { %v3234_v28 = vld [vmem:[#allocation2 + $0x2a0] sm:$0xf]  ;;  %v4282_v30 = vld [vmem:[#allocation2 + $0x2ac] sm:$0xf0]  ;;  %v3107_v33 = vor.u32 %v4250_v27, %v3106_v26  ;;  %1328 = vmatpush.bf16.msra.mxu3 %v3379_v25 }
  0x19   :  { %v3362_v31 = vld [vmem:[#allocation2 + $0x3a0] sm:$0xf]  ;;  %v4314_v32 = vld [vmem:[#allocation2 + $0x3ac] sm:$0xf0]  ;;  %v3235_v34 = vor.u32 %v4282_v30, %v3234_v28  ;;  %1287 = vmatpush.bf16.msra.mxu0 %v2979_v29 }
  0x1a   :  { %v2962_v35 = vld [vmem:[#allocation2 + $0x80] sm:$0xf]  ;;  %v4214_v36 = vld [vmem:[#allocation2 + $0x8c] sm:$0xf0]  ;;  %v3363_v38 = vor.u32 %v4314_v32, %v3362_v31  ;;  %1301 = vmatpush.bf16.msra.mxu1 %v3107_v33  ;;  %v4224_v32 = vld [vmem:[#allocation2 + $0xe4] sm:$0xf] }
  0x1b   :  { %v3090_v37 = vld [vmem:[#allocation2 + $0x180] sm:$0xf]  ;;  %v4246_v39 = vld [vmem:[#allocation2 + $0x18c] sm:$0xf0]  ;;  %v2963_v44 = vor.u32 %v4214_v36, %v2962_v35  ;;  %1315 = vmatpush.bf16.msra.mxu2 %v3235_v34  ;;  %v3012_v33 = vld [vmem:[#allocation2 + $0xf0] sm:$0xf0] }
  0x1c   :  { %v3218_v40 = vld [vmem:[#allocation2 + $0x280] sm:$0xf]  ;;  %v4278_v41 = vld [vmem:[#allocation2 + $0x28c] sm:$0xf0]  ;;  %v3091_v45 = vor.u32 %v4246_v39, %v3090_v37  ;;  %1329 = vmatpush.bf16.msra.mxu3 %v3363_v38  ;;  %v83_v36 = vld [vmem:[%s4834_s0 + $0x48] sm:$0xff] }
  0x1d   :  { %v3346_v42 = vld [vmem:[#allocation2 + $0x380] sm:$0xf]  ;;  %v4310_v43 = vld [vmem:[#allocation2 + $0x38c] sm:$0xf0]  ;;  %v3219_v46 = vor.u32 %v4278_v41, %v3218_v40  ;;  %1288 = vmatpush.bf16.msra.mxu0 %v2963_v44  ;;  %v4256_v41 = vld [vmem:[#allocation2 + $0x1e4] sm:$0xf] }
  0x1e   :  { %v2946_v47 = vld [vmem:[#allocation2 + $0x60] sm:$0xf]  ;;  %v4210_v48 = vld [vmem:[#allocation2 + $0x6c] sm:$0xf0]  ;;  %v3347_v50 = vor.u32 %v4310_v43, %v3346_v42  ;;  %1302 = vmatpush.bf16.msra.mxu1 %v3091_v45  ;;  %v81_v43 = vld [vmem:[%s4834_s0 + $0x38] sm:$0xff] }
  0x1f   :  { %v3074_v49 = vld [vmem:[#allocation2 + $0x160] sm:$0xf]  ;;  %v4242_v51 = vld [vmem:[#allocation2 + $0x16c] sm:$0xf0]  ;;  %v2947_v56 = vor.u32 %v4210_v48, %v2946_v47  ;;  %1316 = vmatpush.bf16.msra.mxu2 %v3219_v46  ;;  %v3140_v46 = vld [vmem:[#allocation2 + $0x1f0] sm:$0xf0] }
  0x20   :  { %v3202_v52 = vld [vmem:[#allocation2 + $0x260] sm:$0xf]  ;;  %v4274_v53 = vld [vmem:[#allocation2 + $0x26c] sm:$0xf0]  ;;  %v3075_v57 = vor.u32 %v4242_v51, %v3074_v49  ;;  %1330 = vmatpush.bf16.msra.mxu3 %v3347_v50  ;;  %v77_v47 = vld [vmem:[%s4834_s0 + $0x18] sm:$0xff]  ;;  %v3015_v50 = vor.u32 %v4224_v32, %v3012_v33 }
  0x21   :  { %v3330_v54 = vld [vmem:[#allocation2 + $0x360] sm:$0xf]  ;;  %v4306_v55 = vld [vmem:[#allocation2 + $0x36c] sm:$0xf0]  ;;  %v3203_v58 = vor.u32 %v4274_v53, %v3202_v52  ;;  %1289 = vmatpush.bf16.msra.mxu0 %v2947_v56 }
  0x22   :  { %v2930_v59 = vld [vmem:[#allocation2 + $0x40] sm:$0xf]  ;;  %v4206_v60 = vld [vmem:[#allocation2 + $0x4c] sm:$0xf0]  ;;  %v3331_v62 = vor.u32 %v4306_v55, %v3330_v54  ;;  %1303 = vmatpush.bf16.msra.mxu1 %v3075_v57  ;;  %v4220_v57 = vld [vmem:[#allocation2 + $0xc4] sm:$0xf] }
  0x23   :  { %v3058_v61 = vld [vmem:[#allocation2 + $0x140] sm:$0xf]  ;;  %v4238_v63 = vld [vmem:[#allocation2 + $0x14c] sm:$0xf0]  ;;  %v2931_v4 = vor.u32 %v4206_v60, %v2930_v59  ;;  %1317 = vmatpush.bf16.msra.mxu2 %v3203_v58  ;;  %v2996_v58 = vld [vmem:[#allocation2 + $0xd0] sm:$0xf0] }
  0x24   :  { %v3186_v0 = vld [vmem:[#allocation2 + $0x240] sm:$0xf]  ;;  %v4270_v1 = vld [vmem:[#allocation2 + $0x24c] sm:$0xf0]  ;;  %v3059_v6 = vor.u32 %v4238_v63, %v3058_v61  ;;  %1331 = vmatpush.bf16.msra.mxu3 %v3331_v62  ;;  %v75_v61 = vld [vmem:[%s4834_s0 + $0x8] sm:$0xff]  ;;  %v3143_v63 = vor.u32 %v4256_v41, %v3140_v46 }
  0x25   :  { %v3314_v2 = vld [vmem:[#allocation2 + $0x340] sm:$0xf]  ;;  %v4302_v3 = vld [vmem:[#allocation2 + $0x34c] sm:$0xf0]  ;;  %v3187_v7 = vor.u32 %v4270_v1, %v3186_v0  ;;  %1290 = vmatpush.bf16.msra.mxu0 %v2931_v4  ;;  %v4252_v1 = vld [vmem:[#allocation2 + $0x1c4] sm:$0xf]  ;;  %v2999_v4 = vor.u32 %v4220_v57, %v2996_v58 }
  0x26   :  { %v2914_v5 = vld [vmem:[#allocation2 + $0x20] sm:$0xf]  ;;  %v4202_v8 = vld [vmem:[#allocation2 + $0x2c] sm:$0xf0]  ;;  %v3315_v11 = vor.u32 %v4302_v3, %v3314_v2  ;;  %1304 = vmatpush.bf16.msra.mxu1 %v3059_v6  ;;  %v3124_v2 = vld [vmem:[#allocation2 + $0x1d0] sm:$0xf0] }
  0x27   :  { %v3042_v9 = vld [vmem:[#allocation2 + $0x120] sm:$0xf]  ;;  %v4234_v10 = vld [vmem:[#allocation2 + $0x12c] sm:$0xf0]  ;;  %v2915_v18 = vor.u32 %v4202_v8, %v2914_v5  ;;  %1318 = vmatpush.bf16.msra.mxu2 %v3187_v7  ;;  %v3076_v41 = vld [vmem:[#allocation2 + $0x170] sm:$0xf0] }
  0x28   :  { %v3170_v12 = vld [vmem:[#allocation2 + $0x220] sm:$0xf]  ;;  %v4266_v13 = vld [vmem:[#allocation2 + $0x22c] sm:$0xf0]  ;;  %v3043_v23 = vor.u32 %v4234_v10, %v3042_v9  ;;  %1332 = vmatpush.bf16.msra.mxu3 %v3315_v11  ;;  %v4216_v10 = vld [vmem:[#allocation2 + $0xa4] sm:$0xf] }
  0x29   :  { %v3298_v14 = vld [vmem:[#allocation2 + $0x320] sm:$0xf]  ;;  %v4298_v15 = vld [vmem:[#allocation2 + $0x32c] sm:$0xf0]  ;;  %v3171_v24 = vor.u32 %v4266_v13, %v3170_v12  ;;  %1291 = vmatpush.bf16.msra.mxu0 %v2915_v18  ;;  %v2980_v11 = vld [vmem:[#allocation2 + $0xb0] sm:$0xf0]  ;;  %v3127_v12 = vor.u32 %v4252_v1, %v3124_v2 }
  0x2a   :  { %v2898_v16 = vld [vmem:[#allocation2] sm:$0xf]  ;;  %v4198_v17 = vld [vmem:[#allocation2 + $0xc] sm:$0xf0]  ;;  %v3299_v28 = vor.u32 %v4298_v15, %v3298_v14  ;;  %1305 = vmatpush.bf16.msra.mxu1 %v3043_v23  ;;  %v4248_v14 = vld [vmem:[#allocation2 + $0x1a4] sm:$0xf] }
  0x2b   :  { %v3026_v19 = vld [vmem:[#allocation2 + $0x100] sm:$0xf]  ;;  %v4230_v20 = vld [vmem:[#allocation2 + $0x10c] sm:$0xf0]  ;;  %v2899_v35 = vor.u32 %v4198_v17, %v2898_v16  ;;  %1319 = vmatpush.bf16.msra.mxu2 %v3171_v24  ;;  %v3108_v15 = vld [vmem:[#allocation2 + $0x1b0] sm:$0xf0]  ;;  %v2983_v17 = vor.u32 %v4216_v10, %v2980_v11 }
  0x2c   :  { %v3154_v21 = vld [vmem:[#allocation2 + $0x200] sm:$0xf]  ;;  %v4262_v22 = vld [vmem:[#allocation2 + $0x20c] sm:$0xf0]  ;;  %v3027_v39 = vor.u32 %v4230_v20, %v3026_v19  ;;  %1333 = vmatpush.bf16.msra.mxu3 %v3299_v28  ;;  %v2964_v23 = vld [vmem:[#allocation2 + $0x90] sm:$0xf0]  ;;  %v3111_v24 = vor.u32 %v4248_v14, %v3108_v15 }
  0x2d   :  { %v3282_v25 = vld [vmem:[#allocation2 + $0x300] sm:$0xf]  ;;  %v4294_v26 = vld [vmem:[#allocation2 + $0x30c] sm:$0xf0]  ;;  %v3155_v40 = vor.u32 %v4262_v22, %v3154_v21  ;;  %1292 = vmatpush.bf16.msra.mxu0 %v2899_v35  ;;  %v4212_v22 = vld [vmem:[#allocation2 + $0x84] sm:$0xf] }
  0x2e   :  { %v3522_v27 = vld [vmem:[#allocation2 + $0x4e0] sm:$0xf]  ;;  %v4354_v29 = vld [vmem:[#allocation2 + $0x4ec] sm:$0xf0]  ;;  %v3283_v44 = vor.u32 %v4294_v26, %v3282_v25  ;;  %1306 = vmatpush.bf16.msra.mxu1 %v3027_v39  ;;  %v4244_v26 = vld [vmem:[#allocation2 + $0x184] sm:$0xf] }
  0x2f   :  { %v3650_v30 = vld [vmem:[#allocation2 + $0x5e0] sm:$0xf]  ;;  %v4386_v31 = vld [vmem:[#allocation2 + $0x5ec] sm:$0xf0]  ;;  %v3523_v45 = vor.u32 %v4354_v29, %v3522_v27  ;;  %1320 = vmatpush.bf16.msra.mxu2 %v3155_v40  ;;  %v3092_v27 = vld [vmem:[#allocation2 + $0x190] sm:$0xf0]  ;;  %v2967_v29 = vor.u32 %v4212_v22, %v2964_v23 }
  0x30   :  { %v76_v34 = vld [vmem:[%s4834_s0 + $0x10] sm:$0xff]  ;;  %v3666_v37 = vld [vmem:[#allocation2 + $0x600] sm:$0xf]  ;;  %v3651_v49 = vor.u32 %v4386_v31, %v3650_v30  ;;  %1334 = vmatpush.bf16.msra.mxu3 %v3283_v44  ;;  %v4240_v40 = vld [vmem:[#allocation2 + $0x164] sm:$0xf] }
  0x31   :  { %v4390_v38 = vld [vmem:[#allocation2 + $0x60c] sm:$0xf0]  ;;  %v74_v42 = vld [vmem:[%s4834_s0] sm:$0xff]  ;;  %v4686_v54 = vpack.c.bf16 %v83_v36, %v76_v34  ;;  %1341 = vmatpush.bf16.msrb.mxu0 %v3523_v45  ;;  %v2948_v35 = vld [vmem:[#allocation2 + $0x70] sm:$0xf0] }
  0x32   :  { %v84_v48 = vld [vmem:[%s4834_s0 + $0x50] sm:$0xff]  ;;  %v3506_v51 = vld [vmem:[#allocation2 + $0x4c0] sm:$0xf]  ;;  %v4688_v55 = vpack.c.bf16 %v81_v43, %v74_v42  ;;  %v3667_v59 = vor.u32 %v4390_v38, %v3666_v37  ;;  %1355 = vmatpush.bf16.msrb.mxu1 %v3651_v49  ;;  %v4208_v34 = vld [vmem:[#allocation2 + $0x64] sm:$0xf]  ;;  %v3095_v38 = vor.u32 %v4244_v26, %v3092_v27 }
  0x33   :  { %v4350_v52 = vld [vmem:[#allocation2 + $0x4cc] sm:$0xf0]  ;;  %v3634_v53 = vld [vmem:[#allocation2 + $0x5c0] sm:$0xf]  ;;  %v4690_v60 = vpack.c.bf16 %v84_v48, %v77_v47  ;;  %1321 = vmatmul.bf16.vlgmr.msra.gmra.mxu2 %v4686_v54  ;;  %v87_v37 = vld [vmem:[%s4834_s0 + $0x68] sm:$0xff]  ;;  %v2951_v43 = vor.u32 %v4208_v34, %v2948_v35 }
  0x34   :  { %v4382_v56 = vld [vmem:[#allocation2 + $0x5cc] sm:$0xf0]  ;;  %v82_v62 = vld [vmem:[%s4834_s0 + $0x40] sm:$0xff]  ;;  %v3507_v0 = vor.u32 %v4350_v52, %v3506_v51  ;;  %1383 = vmatpush.bf16.msrb.mxu3 %v3015_v50  ;;  %1293 = vmatmul.bf16.vlgmr.msra.gmra.mxu0 %v4688_v55  ;;  %v2932_v49 = vld [vmem:[#allocation2 + $0x50] sm:$0xf0]  ;;  %v3079_v51 = vor.u32 %v4240_v40, %v3076_v41 }
  0x35   :  { %v3635_v3 = vor.u32 %v4382_v56, %v3634_v53  ;;  %v3490_v5 = vld [vmem:[#allocation2 + $0x4a0] sm:$0xf]  ;;  %v4346_v6 = vld [vmem:[#allocation2 + $0x4ac] sm:$0xf0]  ;;  %v4700_v8 = vpack.c.bf16 %v82_v62, %v75_v61  ;;  %1376 = vmatpush.bf16.msrb.mxu2 %v3667_v59  ;;  %1335 = vmatmul.bf16.vlgmr.msra.gmra.mxu3 %v4690_v60  ;;  %v4204_v48 = vld [vmem:[#allocation2 + $0x44] sm:$0xf] }
  0x36   :  { %v3618_v7 = vld [vmem:[#allocation2 + $0x5a0] sm:$0xf]  ;;  %v4378_v9 = vld [vmem:[#allocation2 + $0x5ac] sm:$0xf0]  ;;  %1342 = vmatpush.bf16.msrb.mxu0 %v3507_v0  ;;  %v3491_v13 = vor.u32 %v4346_v6, %v3490_v5  ;;  %v4236_v53 = vld [vmem:[#allocation2 + $0x144] sm:$0xf]  ;;  %v2935_v58 = vor.u32 %v4204_v48, %v2932_v49 }
  0x37   :  { %1356 = vmatpush.bf16.msrb.mxu1 %v3635_v3  ;;  %v3619_v16 = vor.u32 %v4378_v9, %v3618_v7  ;;  %v3474_v18 = vld [vmem:[#allocation2 + $0x480] sm:$0xf]  ;;  %v4342_v19 = vld [vmem:[#allocation2 + $0x48c] sm:$0xf0]  ;;  %v3060_v56 = vld [vmem:[#allocation2 + $0x150] sm:$0xf0] }
  0x38   :  { %1384 = vmatpush.bf16.msrb.mxu3 %v2999_v4  ;;  %v3602_v20 = vld [vmem:[#allocation2 + $0x580] sm:$0xf]  ;;  %1307 = vmatmul.bf16.vlgmr.msra.gmra.mxu1 %v4700_v8  ;;  %v4374_v21 = vld [vmem:[#allocation2 + $0x58c] sm:$0xf0]  ;;  %v3475_v25 = vor.u32 %v4342_v19, %v3474_v18  ;;  %v4200_v0 = vld [vmem:[#allocation2 + $0x24] sm:$0xf]  ;;  %v3063_v4 = vor.u32 %v4236_v53, %v3060_v56 }
  0x39   :  { %1397 = vmatpush.bf16.msra.mxu2 %v3143_v63  ;;  %v3603_v28 = vor.u32 %v4374_v21, %v3602_v20  ;;  %v3458_v30 = vld [vmem:[#allocation2 + $0x460] sm:$0xf]  ;;  %v4338_v31 = vld [vmem:[#allocation2 + $0x46c] sm:$0xf0]  ;;  %v2916_v1 = vld [vmem:[#allocation2 + $0x30] sm:$0xf0] }
  0x3a   :  { %1343 = vmatpush.bf16.msrb.mxu0 %v3491_v13  ;;  %v3586_v32 = vld [vmem:[#allocation2 + $0x560] sm:$0xf]  ;;  %v4370_v33 = vld [vmem:[#allocation2 + $0x56c] sm:$0xf0]  ;;  %v3459_v39 = vor.u32 %v4338_v31, %v3458_v30  ;;  %v4232_v2 = vld [vmem:[#allocation2 + $0x124] sm:$0xf]  ;;  %v2919_v11 = vor.u32 %v4200_v0, %v2916_v1 }
  0x3b   :  { %1357 = vmatpush.bf16.msrb.mxu1 %v3619_v16  ;;  %v80_v36 = vld [vmem:[%s4834_s0 + $0x30] sm:$0xff]  ;;  %v3587_v42 = vor.u32 %v4370_v33, %v3586_v32  ;;  %v3442_v44 = vld [vmem:[#allocation2 + $0x440] sm:$0xf]  ;;  %v4196_v13 = vld [vmem:[#allocation2 + $0x4] sm:$0xf] }
  0x3c   :  { %1385 = vmatpush.bf16.msrb.mxu3 %v2983_v17  ;;  %v4334_v45 = vld [vmem:[#allocation2 + $0x44c] sm:$0xf0]  ;;  %v3570_v46 = vld [vmem:[#allocation2 + $0x540] sm:$0xf]  ;;  %v4710_v50 = vpack.c.bf16 %v87_v37, %v80_v36  ;;  %v3044_v3 = vld [vmem:[#allocation2 + $0x130] sm:$0xf0] }
  0x3d   :  { %1398 = vmatpush.bf16.msra.mxu2 %v3127_v12  ;;  %v4366_v47 = vld [vmem:[#allocation2 + $0x54c] sm:$0xf0]  ;;  %v3443_v52 = vor.u32 %v4334_v45, %v3442_v44  ;;  %v3426_v59 = vld [vmem:[#allocation2 + $0x420] sm:$0xf]  ;;  %v2900_v14 = vld [vmem:[#allocation2 + $0x10] sm:$0xf0]  ;;  %v3047_v21 = vor.u32 %v4232_v2, %v3044_v3 }
  0x3e   :  { %1344 = vmatpush.bf16.msrb.mxu0 %v3475_v25  ;;  %v3571_v57 = vor.u32 %v4366_v47, %v3570_v46  ;;  %v4330_v61 = vld [vmem:[#allocation2 + $0x42c] sm:$0xf0]  ;;  %v3554_v62 = vld [vmem:[#allocation2 + $0x520] sm:$0xf]  ;;  %v4288_v15 = vld [vmem:[#allocation2 + $0x2e4] sm:$0xf]  ;;  %v2903_v27 = vor.u32 %v4196_v13, %v2900_v14 }
  0x3f   :  { %1358 = vmatpush.bf16.msrb.mxu1 %v3603_v28  ;;  %v4362_v63 = vld [vmem:[#allocation2 + $0x52c] sm:$0xf0]  ;;  %v3427_v5 = vor.u32 %v4330_v61, %v3426_v59  ;;  %v3410_v6 = vld [vmem:[#allocation2 + $0x400] sm:$0xf]  ;;  %v3268_v16 = vld [vmem:[#allocation2 + $0x2f0] sm:$0xf0] }
  0x40   :  { %1386 = vmatpush.bf16.msrb.mxu3 %v2967_v29  ;;  %v4326_v7 = vld [vmem:[#allocation2 + $0x40c] sm:$0xf0]  ;;  %v3538_v9 = vld [vmem:[#allocation2 + $0x500] sm:$0xf]  ;;  %v3555_v10 = vor.u32 %v4362_v63, %v3554_v62  ;;  %v4320_v17 = vld [vmem:[#allocation2 + $0x3e4] sm:$0xf]  ;;  %v3271_v31 = vor.u32 %v4288_v15, %v3268_v16 }
  0x41   :  { %1399 = vmatpush.bf16.msra.mxu2 %v3111_v24  ;;  %v4358_v12 = vld [vmem:[#allocation2 + $0x50c] sm:$0xf0]  ;;  %v3396_v18 = vld [vmem:[#allocation2 + $0x3f0] sm:$0xf0]  ;;  %v4352_v19 = vld [vmem:[#allocation2 + $0x4e4] sm:$0xf]  ;;  %v3411_v22 = vor.u32 %v4326_v7, %v3410_v6 }
  0x42   :  { %1345 = vmatpush.bf16.msrb.mxu0 %v3459_v39  ;;  %v3524_v20 = vld [vmem:[#allocation2 + $0x4f0] sm:$0xf0]  ;;  %v78_v23 = vld [vmem:[%s4834_s0 + $0x20] sm:$0xff]  ;;  %v85_v24 = vld [vmem:[%s4834_s0 + $0x58] sm:$0xff]  ;;  %v3539_v26 = vor.u32 %v4358_v12, %v3538_v9  ;;  %v3399_v32 = vor.u32 %v4320_v17, %v3396_v18 }
  0x43   :  { %1359 = vmatpush.bf16.msrb.mxu1 %v3587_v42  ;;  %3680 = vmatmul.msk.bf16.vlgmr.msrb.gmra.mxu2 %vm1281_vm0, %v4710_v50  ;;  %v4228_v25 = vld [vmem:[#allocation2 + $0x104] sm:$0xf]  ;;  %v3028_v28 = vld [vmem:[#allocation2 + $0x110] sm:$0xf0]  ;;  %v79_v29 = vld [vmem:[%s4834_s0 + $0x28] sm:$0xff]  ;;  %v3527_v36 = vor.u32 %v4352_v19, %v3524_v20  ;;  %v4726_v37 = vpack.c.bf16 %v85_v24, %v78_v23 }
  0x44   :  { %1387 = vmatpush.bf16.msrb.mxu3 %v2951_v43  ;;  %v86_v30 = vld [vmem:[%s4834_s0 + $0x60] sm:$0xff]  ;;  %v3652_v34 = vld [vmem:[#allocation2 + $0x5f0] sm:$0xf0]  ;;  %v3031_v41 = vor.u32 %v4228_v25, %v3028_v28 }
  0x45   :  { %1400 = vmatpush.bf16.msra.mxu2 %v3095_v38  ;;  %v4384_v33 = vld [vmem:[#allocation2 + $0x5e4] sm:$0xf]  ;;  %v3252_v38 = vld [vmem:[#allocation2 + $0x2d0] sm:$0xf0]  ;;  %v4728_v42 = vpack.c.bf16 %v86_v30, %v79_v29 }
  0x46   :  { %1346 = vmatpush.bf16.msrb.mxu0 %v3443_v52  ;;  %v4284_v35 = vld [vmem:[#allocation2 + $0x2c4] sm:$0xf]  ;;  %v3380_v40 = vld [vmem:[#allocation2 + $0x3d0] sm:$0xf0]  ;;  %v3655_v45 = vor.u32 %v4384_v33, %v3652_v34 }
  0x47   :  { %1360 = vmatpush.bf16.msrb.mxu1 %v3571_v57  ;;  %v4316_v39 = vld [vmem:[#allocation2 + $0x3c4] sm:$0xf]  ;;  %v3508_v44 = vld [vmem:[#allocation2 + $0x4d0] sm:$0xf0]  ;;  %v3255_v46 = vor.u32 %v4284_v35, %v3252_v38 }
  0x48   :  { %1388 = vmatpush.bf16.msrb.mxu3 %v2935_v58  ;;  %v4348_v43 = vld [vmem:[#allocation2 + $0x4c4] sm:$0xf]  ;;  %v3383_v47 = vor.u32 %v4316_v39, %v3380_v40  ;;  %v3636_v49 = vld [vmem:[#allocation2 + $0x5d0] sm:$0xf0] }
  0x49   :  { %1401 = vmatpush.bf16.msra.mxu2 %v3079_v51  ;;  %v4380_v48 = vld [vmem:[#allocation2 + $0x5c4] sm:$0xf]  ;;  %v3511_v52 = vor.u32 %v4348_v43, %v3508_v44  ;;  %v3236_v53 = vld [vmem:[#allocation2 + $0x2b0] sm:$0xf0] }
  0x4a   :  { %1347 = vmatpush.bf16.msrb.mxu0 %v3427_v5  ;;  %v4280_v51 = vld [vmem:[#allocation2 + $0x2a4] sm:$0xf]  ;;  %v3364_v57 = vld [vmem:[#allocation2 + $0x3b0] sm:$0xf0]  ;;  %v3639_v61 = vor.u32 %v4380_v48, %v3636_v49 }
  0x4b   :  { %1361 = vmatpush.bf16.msrb.mxu1 %v3555_v10  ;;  %v4312_v56 = vld [vmem:[#allocation2 + $0x3a4] sm:$0xf]  ;;  %v3492_v59 = vld [vmem:[#allocation2 + $0x4b0] sm:$0xf0]  ;;  %v3239_v62 = vor.u32 %v4280_v51, %v3236_v53 }
  0x4c   :  { %1389 = vmatpush.bf16.msrb.mxu3 %v2919_v11  ;;  %v4344_v58 = vld [vmem:[#allocation2 + $0x4a4] sm:$0xf]  ;;  %v3367_v63 = vor.u32 %v4312_v56, %v3364_v57  ;;  %v3620_v1 = vld [vmem:[#allocation2 + $0x5b0] sm:$0xf0] }
  0x4d   :  { %1402 = vmatpush.bf16.msra.mxu2 %v3063_v4  ;;  %v4376_v0 = vld [vmem:[#allocation2 + $0x5a4] sm:$0xf]  ;;  %v3495_v3 = vor.u32 %v4344_v58, %v3492_v59  ;;  %v3220_v4 = vld [vmem:[#allocation2 + $0x290] sm:$0xf0] }
  0x4e   :  { %1348 = vmatpush.bf16.msrb.mxu0 %v3411_v22  ;;  %v4276_v2 = vld [vmem:[#allocation2 + $0x284] sm:$0xf]  ;;  %v3348_v6 = vld [vmem:[#allocation2 + $0x390] sm:$0xf0]  ;;  %v3623_v10 = vor.u32 %v4376_v0, %v3620_v1  ;;  %v3018_v0 = vld [vmem:[#allocation2 + $0xe8] sm:$0xf] }
  0x4f   :  { %1362 = vmatpush.bf16.msrb.mxu1 %v3539_v26  ;;  %v4308_v5 = vld [vmem:[#allocation2 + $0x384] sm:$0xf]  ;;  %v3476_v9 = vld [vmem:[#allocation2 + $0x490] sm:$0xf0]  ;;  %v3223_v11 = vor.u32 %v4276_v2, %v3220_v4  ;;  %v4227_v1 = vld [vmem:[#allocation2 + $0xf4] sm:$0xf0] }
  0x50   :  { %1390 = vmatpush.bf16.msrb.mxu3 %v2903_v27  ;;  %v4340_v7 = vld [vmem:[#allocation2 + $0x484] sm:$0xf]  ;;  %v3351_v12 = vor.u32 %v4308_v5, %v3348_v6  ;;  %v3604_v14 = vld [vmem:[#allocation2 + $0x590] sm:$0xf0]  ;;  %v3274_v5 = vld [vmem:[#allocation2 + $0x2e8] sm:$0xf] }
  0x51   :  { %1403 = vmatpush.bf16.msra.mxu2 %v3047_v21  ;;  %1349 = vmatmul.bf16.vlgmr.msrb.gmra.mxu0 %v4726_v37  ;;  %v4372_v13 = vld [vmem:[#allocation2 + $0x584] sm:$0xf]  ;;  %v3479_v16 = vor.u32 %v4340_v7, %v3476_v9  ;;  %v3204_v17 = vld [vmem:[#allocation2 + $0x270] sm:$0xf0]  ;;  %v4291_v6 = vld [vmem:[#allocation2 + $0x2f4] sm:$0xf0] }
  0x52   :  { %1411 = vmatpush.bf16.msra.mxu0 %v3271_v31  ;;  %1363 = vmatmul.bf16.vlgmr.msrb.gmra.mxu1 %v4728_v42  ;;  %v4272_v15 = vld [vmem:[#allocation2 + $0x264] sm:$0xf]  ;;  %v3332_v19 = vld [vmem:[#allocation2 + $0x370] sm:$0xf0]  ;;  %v3607_v22 = vor.u32 %v4372_v13, %v3604_v14  ;;  %v3019_v13 = vor.u32 %v4227_v1, %v3018_v0  ;;  %v3402_v14 = vld [vmem:[#allocation2 + $0x3e8] sm:$0xf] }
  0x53   :  { %1425 = vmatpush.bf16.msra.mxu1 %v3399_v32  ;;  %1391 = vmatmul.bf16.vlgmr.msrb.gmra.mxu3 %v4688_v55  ;;  %v4304_v18 = vld [vmem:[#allocation2 + $0x364] sm:$0xf]  ;;  %v3460_v21 = vld [vmem:[#allocation2 + $0x470] sm:$0xf0]  ;;  %v3207_v23 = vor.u32 %v4272_v15, %v3204_v17  ;;  %v4323_v15 = vld [vmem:[#allocation2 + $0x3f4] sm:$0xf0] }
  0x54   :  { %1439 = vmatpush.bf16.msra.mxu3 %v3527_v36  ;;  %v4336_v20 = vld [vmem:[#allocation2 + $0x464] sm:$0xf]  ;;  %v3335_v24 = vor.u32 %v4304_v18, %v3332_v19  ;;  %v3588_v26 = vld [vmem:[#allocation2 + $0x570] sm:$0xf0]  ;;  %v3146_v17 = vld [vmem:[#allocation2 + $0x1e8] sm:$0xf]  ;;  %v3275_v19 = vor.u32 %v4291_v6, %v3274_v5 }
  0x55   :  { %1404 = vmatpush.bf16.msra.mxu2 %v3031_v41  ;;  %v4368_v25 = vld [vmem:[#allocation2 + $0x564] sm:$0xf]  ;;  %v3463_v28 = vor.u32 %v4336_v20, %v3460_v21  ;;  %v3188_v29 = vld [vmem:[#allocation2 + $0x250] sm:$0xf0]  ;;  %v4259_v18 = vld [vmem:[#allocation2 + $0x1f4] sm:$0xf0] }
  0x56   :  { %1412 = vmatpush.bf16.msra.mxu0 %v3255_v46  ;;  %v4268_v27 = vld [vmem:[#allocation2 + $0x244] sm:$0xf]  ;;  %v3316_v31 = vld [vmem:[#allocation2 + $0x350] sm:$0xf0]  ;;  %v3591_v34 = vor.u32 %v4368_v25, %v3588_v26  ;;  %v3002_v21 = vld [vmem:[#allocation2 + $0xc8] sm:$0xf]  ;;  %v3147_v26 = vor.u32 %v4259_v18, %v3146_v17 }
  0x57   :  { %1426 = vmatpush.bf16.msra.mxu1 %v3383_v47  ;;  %v4300_v30 = vld [vmem:[#allocation2 + $0x344] sm:$0xf]  ;;  %v3444_v33 = vld [vmem:[#allocation2 + $0x450] sm:$0xf0]  ;;  %v3191_v35 = vor.u32 %v4268_v27, %v3188_v29  ;;  %v4287_v25 = vld [vmem:[#allocation2 + $0x2d4] sm:$0xf0] }
  0x58   :  { %1440 = vmatpush.bf16.msra.mxu3 %v3511_v52  ;;  %1405 = vmatmul.bf16.vlgmr.msra.gmra.mxu2 %v4700_v8  ;;  %v4332_v32 = vld [vmem:[#allocation2 + $0x444] sm:$0xf]  ;;  %v3319_v36 = vor.u32 %v4300_v30, %v3316_v31  ;;  %v3572_v39 = vld [vmem:[#allocation2 + $0x550] sm:$0xf0]  ;;  %v3386_v27 = vld [vmem:[#allocation2 + $0x3c8] sm:$0xf] }
  0x59   :  { %1453 = vmatpush.bf16.msrb.mxu2 %v3655_v45  ;;  %v4364_v38 = vld [vmem:[#allocation2 + $0x544] sm:$0xf]  ;;  %v3447_v41 = vor.u32 %v4332_v32, %v3444_v33  ;;  %v3172_v43 = vld [vmem:[#allocation2 + $0x230] sm:$0xf0]  ;;  %v3130_v30 = vld [vmem:[#allocation2 + $0x1c8] sm:$0xf] }
  0x5a   :  { %1413 = vmatpush.bf16.msra.mxu0 %v3239_v62  ;;  %v4264_v40 = vld [vmem:[#allocation2 + $0x224] sm:$0xf]  ;;  %v3300_v45 = vld [vmem:[#allocation2 + $0x330] sm:$0xf0]  ;;  %v3575_v48 = vor.u32 %v4364_v38, %v3572_v39  ;;  %v4255_v31 = vld [vmem:[#allocation2 + $0x1d4] sm:$0xf0] }
  0x5b   :  { %1427 = vmatpush.bf16.msra.mxu1 %v3367_v63  ;;  %v4296_v44 = vld [vmem:[#allocation2 + $0x324] sm:$0xf]  ;;  %v3428_v47 = vld [vmem:[#allocation2 + $0x430] sm:$0xf0]  ;;  %v3175_v52 = vor.u32 %v4264_v40, %v3172_v43  ;;  %v2986_v33 = vld [vmem:[#allocation2 + $0xa8] sm:$0xf]  ;;  %v3131_v39 = vor.u32 %v4255_v31, %v3130_v30 }
  0x5c   :  { %1441 = vmatpush.bf16.msra.mxu3 %v3495_v3  ;;  %v4328_v46 = vld [vmem:[#allocation2 + $0x424] sm:$0xf]  ;;  %v3556_v51 = vld [vmem:[#allocation2 + $0x530] sm:$0xf0]  ;;  %v3303_v53 = vor.u32 %v4296_v44, %v3300_v45  ;;  %v4283_v38 = vld [vmem:[#allocation2 + $0x2b4] sm:$0xf0] }
  0x5d   :  { %1454 = vmatpush.bf16.msrb.mxu2 %v3639_v61  ;;  %v4360_v49 = vld [vmem:[#allocation2 + $0x524] sm:$0xf]  ;;  %v3156_v57 = vld [vmem:[#allocation2 + $0x210] sm:$0xf0]  ;;  %v3431_v59 = vor.u32 %v4328_v46, %v3428_v47  ;;  %v3370_v40 = vld [vmem:[#allocation2 + $0x3a8] sm:$0xf] }
  0x5e   :  { %1414 = vmatpush.bf16.msra.mxu0 %v3223_v11  ;;  %v4260_v56 = vld [vmem:[#allocation2 + $0x204] sm:$0xf]  ;;  %v3284_v61 = vld [vmem:[#allocation2 + $0x310] sm:$0xf0]  ;;  %v3559_v3 = vor.u32 %v4360_v49, %v3556_v51  ;;  %v3114_v44 = vld [vmem:[#allocation2 + $0x1a8] sm:$0xf] }
  0x5f   :  { %1428 = vmatpush.bf16.msra.mxu1 %v3351_v12  ;;  %v4292_v58 = vld [vmem:[#allocation2 + $0x304] sm:$0xf]  ;;  %v3412_v63 = vld [vmem:[#allocation2 + $0x410] sm:$0xf0]  ;;  %v3159_v7 = vor.u32 %v4260_v56, %v3156_v57  ;;  %v4251_v45 = vld [vmem:[#allocation2 + $0x1b4] sm:$0xf0] }
  0x60   :  { %1442 = vmatpush.bf16.msra.mxu3 %v3479_v16  ;;  %v4324_v62 = vld [vmem:[#allocation2 + $0x404] sm:$0xf]  ;;  %v3668_v4 = vld [vmem:[#allocation2 + $0x610] sm:$0xf0]  ;;  %v3287_v9 = vor.u32 %v4292_v58, %v3284_v61  ;;  %v2970_v47 = vld [vmem:[#allocation2 + $0x88] sm:$0xf] }
  0x61   :  { %1455 = vmatpush.bf16.msrb.mxu2 %v3623_v10  ;;  %v4388_v2 = vld [vmem:[#allocation2 + $0x604] sm:$0xf]  ;;  %v3540_v11 = vld [vmem:[#allocation2 + $0x510] sm:$0xf0]  ;;  %v3415_v12 = vor.u32 %v4324_v62, %v3412_v63  ;;  %v3226_v51 = vld [vmem:[#allocation2 + $0x288] sm:$0xf] }
  0x62   :  { %1415 = vmatpush.bf16.msra.mxu0 %v3207_v23  ;;  %v4356_v10 = vld [vmem:[#allocation2 + $0x504] sm:$0xf]  ;;  %v3671_v16 = vor.u32 %v4388_v2, %v3668_v4  ;;  %v3403_v23 = vor.u32 %v4323_v15, %v3402_v14  ;;  %v3354_v56 = vld [vmem:[#allocation2 + $0x388] sm:$0xf]  ;;  %v4311_v57 = vld [vmem:[#allocation2 + $0x394] sm:$0xf0] }
  0x63   :  { %1429 = vmatpush.bf16.msra.mxu1 %v3335_v24  ;;  %v3543_v20 = vor.u32 %v4356_v10, %v3540_v11  ;;  %v3258_v24 = vld [vmem:[#allocation2 + $0x2c8] sm:$0xf]  ;;  %v4247_v61 = vld [vmem:[#allocation2 + $0x194] sm:$0xf0]  ;;  %v3355_v1 = vor.u32 %v4311_v57, %v3354_v56  ;;  %v4225_v56 = vld [vmem:[#allocation2 + $0xec] sm:$0xf] }
  0x64   :  { %1443 = vmatpush.bf16.msra.mxu3 %v3463_v28  ;;  %v4319_v28 = vld [vmem:[#allocation2 + $0x3d4] sm:$0xf0]  ;;  %v3259_v32 = vor.u32 %v4287_v25, %v3258_v24  ;;  %v2954_v63 = vld [vmem:[#allocation2 + $0x68] sm:$0xf]  ;;  %v3020_v57 = vld [vmem:[#allocation2 + $0xf8] sm:$0xf0] }
  0x65   :  { %1456 = vmatpush.bf16.msrb.mxu2 %v3607_v22  ;;  %v4223_v22 = vld [vmem:[#allocation2 + $0xd4] sm:$0xf0]  ;;  %v3210_v2 = vld [vmem:[#allocation2 + $0x268] sm:$0xf] }
  0x66   :  { %1416 = vmatpush.bf16.msra.mxu0 %v3191_v35  ;;  %v3003_v29 = vor.u32 %v4223_v22, %v3002_v21  ;;  %v3387_v35 = vor.u32 %v4319_v28, %v3386_v27  ;;  %v4211_v0 = vld [vmem:[#allocation2 + $0x74] sm:$0xf0]  ;;  %v3338_v5 = vld [vmem:[#allocation2 + $0x368] sm:$0xf] }
  0x67   :  { %1430 = vmatpush.bf16.msra.mxu1 %v3319_v36  ;;  %v3242_v36 = vld [vmem:[#allocation2 + $0x2a8] sm:$0xf]  ;;  %v4307_v6 = vld [vmem:[#allocation2 + $0x374] sm:$0xf0] }
  0x68   :  { %1444 = vmatpush.bf16.msra.mxu3 %v3447_v41  ;;  %v4315_v41 = vld [vmem:[#allocation2 + $0x3b4] sm:$0xf0]  ;;  %v3243_v46 = vor.u32 %v4283_v38, %v3242_v36  ;;  %v3339_v14 = vor.u32 %v4307_v6, %v3338_v5  ;;  %v3194_v15 = vld [vmem:[#allocation2 + $0x248] sm:$0xf]  ;;  %v3023_v6 = vor.u32 %v4225_v56, %v3020_v57 }
  0x69   :  { %1457 = vmatpush.bf16.msrb.mxu2 %v3591_v34  ;;  %v4219_v34 = vld [vmem:[#allocation2 + $0xb4] sm:$0xf0]  ;;  %v3371_v49 = vor.u32 %v4315_v41, %v3370_v40  ;;  %v3322_v18 = vld [vmem:[#allocation2 + $0x348] sm:$0xf] }
  0x6a   :  { %1417 = vmatpush.bf16.msra.mxu0 %v3175_v52  ;;  %v2987_v43 = vor.u32 %v4219_v34, %v2986_v33  ;;  %v4279_v52 = vld [vmem:[#allocation2 + $0x294] sm:$0xf0]  ;;  %v3066_v21 = vld [vmem:[#allocation2 + $0x148] sm:$0xf] }
  0x6b   :  { %1431 = vmatpush.bf16.msra.mxu1 %v3303_v53  ;;  %v3115_v53 = vor.u32 %v4251_v45, %v3114_v44  ;;  %v3227_v62 = vor.u32 %v4279_v52, %v3226_v51  ;;  %v4243_v10 = vld [vmem:[#allocation2 + $0x174] sm:$0xf0]  ;;  %v2922_v24 = vld [vmem:[#allocation2 + $0x28] sm:$0xf] }
  0x6c   :  { %1445 = vmatpush.bf16.msra.mxu3 %v3431_v59  ;;  %v3098_v59 = vld [vmem:[#allocation2 + $0x188] sm:$0xf]  ;;  %v4239_v22 = vld [vmem:[#allocation2 + $0x154] sm:$0xf0] }
  0x6d   :  { %1458 = vmatpush.bf16.msrb.mxu2 %v3575_v48  ;;  %v4215_v48 = vld [vmem:[#allocation2 + $0x94] sm:$0xf0]  ;;  %v3099_v4 = vor.u32 %v4247_v61, %v3098_v59  ;;  %v3178_v27 = vld [vmem:[#allocation2 + $0x228] sm:$0xf] }
  0x6e   :  { %1418 = vmatpush.bf16.msra.mxu0 %v3159_v7  ;;  %v2971_v58 = vor.u32 %v4215_v48, %v2970_v47  ;;  %v2955_v7 = vor.u32 %v4211_v0, %v2954_v63  ;;  %v4203_v25 = vld [vmem:[#allocation2 + $0x34] sm:$0xf0]  ;;  %v3306_v30 = vld [vmem:[#allocation2 + $0x328] sm:$0xf] }
  0x6f   :  { %1432 = vmatpush.bf16.msra.mxu1 %v3287_v9  ;;  %v3082_v9 = vld [vmem:[#allocation2 + $0x168] sm:$0xf]  ;;  %v4267_v28 = vld [vmem:[#allocation2 + $0x234] sm:$0xf0] }
  0x70   :  { %1446 = vmatpush.bf16.msra.mxu3 %v3415_v12  ;;  %v2938_v12 = vld [vmem:[#allocation2 + $0x48] sm:$0xf]  ;;  %v3083_v17 = vor.u32 %v4243_v10, %v3082_v9  ;;  %v4299_v31 = vld [vmem:[#allocation2 + $0x334] sm:$0xf0]  ;;  %v3179_v36 = vor.u32 %v4267_v28, %v3178_v27  ;;  %v4221_v9 = vld [vmem:[#allocation2 + $0xcc] sm:$0xf] }
  0x71   :  { %1459 = vmatpush.bf16.msrb.mxu2 %v3559_v3  ;;  %1419 = vmatmul.bf16.vlgmr.msra.gmra.mxu0 %v4686_v54  ;;  %v4275_v3 = vld [vmem:[#allocation2 + $0x274] sm:$0xf0]  ;;  %v3050_v33 = vld [vmem:[#allocation2 + $0x128] sm:$0xf]  ;;  %v3307_v41 = vor.u32 %v4299_v31, %v3306_v30  ;;  %v3004_v10 = vld [vmem:[#allocation2 + $0xd8] sm:$0xf0] }
  0x72   :  { %1509 = vmatpush.bf16.msrb.mxu0 %v3275_v19  ;;  %1433 = vmatmul.bf16.vlgmr.msra.gmra.mxu1 %v4690_v60  ;;  %v3211_v11 = vor.u32 %v4275_v3, %v3210_v2  ;;  %v4303_v19 = vld [vmem:[#allocation2 + $0x354] sm:$0xf0]  ;;  %v3162_v44 = vld [vmem:[#allocation2 + $0x208] sm:$0xf]  ;;  %v4257_v3 = vld [vmem:[#allocation2 + $0x1ec] sm:$0xf] }
  0x73   :  { %1481 = vmatpush.bf16.msrb.mxu1 %v3019_v13  ;;  %1447 = vmatmul.bf16.vlgmr.msra.gmra.mxu3 %v4726_v37  ;;  %v4207_v13 = vld [vmem:[#allocation2 + $0x54] sm:$0xf0]  ;;  %v3658_v61 = vld [vmem:[#allocation2 + $0x5e8] sm:$0xf]  ;;  %v3116_v30 = vld [vmem:[#allocation2 + $0x1b8] sm:$0xf0] }
  0x74   :  { %1474 = vmatpush.bf16.msrb.mxu3 %v3671_v16  ;;  %v4271_v16 = vld [vmem:[#allocation2 + $0x254] sm:$0xf0]  ;;  %v3514_v63 = vld [vmem:[#allocation2 + $0x4c8] sm:$0xf] }
  0x75   :  { %1460 = vmatpush.bf16.msrb.mxu2 %v3543_v20  ;;  %v2939_v20 = vor.u32 %v4207_v13, %v2938_v12  ;;  %v4235_v34 = vld [vmem:[#allocation2 + $0x134] sm:$0xf0]  ;;  %v3642_v13 = vld [vmem:[#allocation2 + $0x5c8] sm:$0xf] }
  0x76   :  { %1510 = vmatpush.bf16.msrb.mxu0 %v3259_v32  ;;  %v2923_v32 = vor.u32 %v4203_v25, %v2922_v24  ;;  %v4199_v38 = vld [vmem:[#allocation2 + $0x14] sm:$0xf0]  ;;  %v3051_v47 = vor.u32 %v4235_v34, %v3050_v33  ;;  %v3626_v25 = vld [vmem:[#allocation2 + $0x5a8] sm:$0xf]  ;;  %v4213_v33 = vld [vmem:[#allocation2 + $0x8c] sm:$0xf] }
  0x77   :  { %1482 = vmatpush.bf16.msrb.mxu1 %v3003_v29  ;;  %v3067_v29 = vor.u32 %v4239_v22, %v3066_v21  ;;  %v4355_v40 = vld [vmem:[#allocation2 + $0x4f4] sm:$0xf0]  ;;  %v4217_v21 = vld [vmem:[#allocation2 + $0xac] sm:$0xf]  ;;  %v2988_v22 = vld [vmem:[#allocation2 + $0xb8] sm:$0xf0] }
  0x78   :  { %1495 = vmatpush.bf16.msra.mxu3 %v3147_v26  ;;  %1461 = vmatmul.bf16.vlgmr.msrb.gmra.mxu2 %v4728_v42  ;;  %v3323_v26 = vor.u32 %v4303_v19, %v3322_v18  ;;  %v4263_v45 = vld [vmem:[#allocation2 + $0x214] sm:$0xf0]  ;;  %v3132_v18 = vld [vmem:[#allocation2 + $0x1d8] sm:$0xf0]  ;;  %v3007_v19 = vor.u32 %v4221_v9, %v3004_v10  ;;  %v3482_v27 = vld [vmem:[#allocation2 + $0x488] sm:$0xf]  ;;  %v2991_v31 = vor.u32 %v4217_v21, %v2988_v22 }
  0x79   :  { %1523 = vmatpush.bf16.msra.mxu2 %v3403_v23  ;;  %v3195_v23 = vor.u32 %v4271_v16, %v3194_v15  ;;  %v4295_v48 = vld [vmem:[#allocation2 + $0x314] sm:$0xf0]  ;;  %v3163_v59 = vor.u32 %v4263_v45, %v3162_v44  ;;  %v3498_v15 = vld [vmem:[#allocation2 + $0x4a8] sm:$0xf]  ;;  %v2972_v34 = vld [vmem:[#allocation2 + $0x98] sm:$0xf0] }
  0x7a   :  { %1511 = vmatpush.bf16.msrb.mxu0 %v3243_v46  ;;  %v3290_v46 = vld [vmem:[#allocation2 + $0x308] sm:$0xf]  ;;  %v4391_v51 = vld [vmem:[#allocation2 + $0x614] sm:$0xf0]  ;;  %v3100_v44 = vld [vmem:[#allocation2 + $0x198] sm:$0xf0]  ;;  %v2975_v45 = vor.u32 %v4213_v33, %v2972_v34 }
  0x7b   :  { %1483 = vmatpush.bf16.msrb.mxu1 %v2987_v43  ;;  %v3034_v43 = vld [vmem:[#allocation2 + $0x108] sm:$0xf]  ;;  %v3291_v0 = vor.u32 %v4295_v48, %v3290_v46  ;;  %v4347_v16 = vld [vmem:[#allocation2 + $0x4b4] sm:$0xf0]  ;;  %v2956_v48 = vld [vmem:[#allocation2 + $0x78] sm:$0xf0] }
  0x7c   :  { %1496 = vmatpush.bf16.msra.mxu3 %v3131_v39  ;;  %v3530_v39 = vld [vmem:[#allocation2 + $0x4e8] sm:$0xf]  ;;  %v4343_v28 = vld [vmem:[#allocation2 + $0x494] sm:$0xf0]  ;;  %v3068_v9 = vld [vmem:[#allocation2 + $0x158] sm:$0xf0] }
  0x7d   :  { %1524 = vmatpush.bf16.msra.mxu2 %v3387_v35  ;;  %v2906_v35 = vld [vmem:[#allocation2 + $0x8] sm:$0xf]  ;;  %v4335_v57 = vld [vmem:[#allocation2 + $0x454] sm:$0xf0]  ;;  %v3052_v21 = vld [vmem:[#allocation2 + $0x138] sm:$0xf0] }
  0x7e   :  { %1512 = vmatpush.bf16.msrb.mxu0 %v3227_v62  ;;  %v2907_v52 = vor.u32 %v4199_v38, %v2906_v35  ;;  %v4387_v62 = vld [vmem:[#allocation2 + $0x5f4] sm:$0xf0]  ;;  %v3483_v35 = vor.u32 %v4343_v28, %v3482_v27  ;;  %v3610_v38 = vld [vmem:[#allocation2 + $0x588] sm:$0xf]  ;;  %v4197_v27 = vld [vmem:[#allocation2 + $0xc] sm:$0xf] }
  0x7f   :  { %1484 = vmatpush.bf16.msrb.mxu1 %v2971_v58  ;;  %v3531_v58 = vor.u32 %v4355_v40, %v3530_v39  ;;  %v4375_v39 = vld [vmem:[#allocation2 + $0x594] sm:$0xf0]  ;;  %v3466_v40 = vld [vmem:[#allocation2 + $0x468] sm:$0xf]  ;;  %v2908_v28 = vld [vmem:[#allocation2 + $0x18] sm:$0xf0] }
  0x80   :  { %1497 = vmatpush.bf16.msra.mxu3 %v3115_v53  ;;  %v4231_v53 = vld [vmem:[#allocation2 + $0x114] sm:$0xf0]  ;;  %v3611_v46 = vor.u32 %v4375_v39, %v3610_v38  ;;  %v3450_v56 = vld [vmem:[#allocation2 + $0x448] sm:$0xf]  ;;  %v3404_v33 = vld [vmem:[#allocation2 + $0x3f8] sm:$0xf0]  ;;  %v2911_v39 = vor.u32 %v4197_v27, %v2908_v28 }
  0x81   :  { %1525 = vmatpush.bf16.msra.mxu2 %v3371_v49  ;;  %v3674_v49 = vld [vmem:[#allocation2 + $0x608] sm:$0xf]  ;;  %v3035_v5 = vor.u32 %v4231_v53, %v3034_v43  ;;  %v4245_v43 = vld [vmem:[#allocation2 + $0x18c] sm:$0xf]  ;;  %v4371_v53 = vld [vmem:[#allocation2 + $0x574] sm:$0xf0] }
  0x82   :  { %1513 = vmatpush.bf16.msrb.mxu0 %v3211_v11  ;;  %v3675_v2 = vor.u32 %v4391_v51, %v3674_v49  ;;  %v3103_v51 = vor.u32 %v4245_v43, %v3100_v44  ;;  %v4285_v38 = vld [vmem:[#allocation2 + $0x2cc] sm:$0xf]  ;;  %v3036_v43 = vld [vmem:[#allocation2 + $0x118] sm:$0xf0] }
  0x83   :  { %1485 = vmatpush.bf16.msrb.mxu1 %v2955_v7  ;;  %3681 = vmatmul.msk.bf16.vlgmr.msrb.gmra.mxu3 %vm1281_vm0, %v4710_v50  ;;  %v3659_v7 = vor.u32 %v4387_v62, %v3658_v61  ;;  %v3340_v28 = vld [vmem:[#allocation2 + $0x378] sm:$0xf0] }
  0x84   :  { %1498 = vmatpush.bf16.msra.mxu3 %v3099_v4  ;;  %v3148_v4 = vld [vmem:[#allocation2 + $0x1f8] sm:$0xf0] }
  0x85   :  { %1526 = vmatpush.bf16.msra.mxu2 %v3355_v1  ;;  %v4351_v1 = vld [vmem:[#allocation2 + $0x4d4] sm:$0xf0]  ;;  %v3151_v12 = vor.u32 %v4257_v3, %v3148_v4  ;;  %v3578_v3 = vld [vmem:[#allocation2 + $0x548] sm:$0xf] }
  0x86   :  { %1514 = vmatpush.bf16.msrb.mxu0 %v3195_v23  ;;  %v3515_v11 = vor.u32 %v4351_v1, %v3514_v63  ;;  %v3499_v23 = vor.u32 %v4347_v16, %v3498_v15  ;;  %v4205_v63 = vld [vmem:[#allocation2 + $0x4c] sm:$0xf]  ;;  %v3451_v1 = vor.u32 %v4335_v57, %v3450_v56  ;;  %v4367_v4 = vld [vmem:[#allocation2 + $0x554] sm:$0xf0]  ;;  %v3562_v16 = vld [vmem:[#allocation2 + $0x528] sm:$0xf] }
  0x87   :  { %1486 = vmatpush.bf16.msrb.mxu1 %v2939_v20  ;;  %v4349_v56 = vld [vmem:[#allocation2 + $0x4cc] sm:$0xf]  ;;  %v3516_v57 = vld [vmem:[#allocation2 + $0x4d8] sm:$0xf0] }
  0x88   :  { %1499 = vmatpush.bf16.msra.mxu3 %v3083_v17  ;;  %v4253_v17 = vld [vmem:[#allocation2 + $0x1cc] sm:$0xf] }
  0x89   :  { %1527 = vmatpush.bf16.msra.mxu2 %v3339_v14  ;;  %v4383_v14 = vld [vmem:[#allocation2 + $0x5d4] sm:$0xf0]  ;;  %v3135_v24 = vor.u32 %v4253_v17, %v3132_v18  ;;  %v3418_v18 = vld [vmem:[#allocation2 + $0x408] sm:$0xf] }
  0x8a   :  { %1515 = vmatpush.bf16.msrb.mxu0 %v3179_v36  ;;  %v3643_v20 = vor.u32 %v4383_v14, %v3642_v13  ;;  %v2924_v13 = vld [vmem:[#allocation2 + $0x38] sm:$0xf0]  ;;  %v4363_v17 = vld [vmem:[#allocation2 + $0x534] sm:$0xf0] }
  0x8b   :  { %1487 = vmatpush.bf16.msrb.mxu1 %v2923_v32 }
  0x8c   :  { %1500 = vmatpush.bf16.msra.mxu3 %v3067_v29  ;;  %v4249_v29 = vld [vmem:[#allocation2 + $0x1ac] sm:$0xf] }
  0x8d   :  { %1528 = vmatpush.bf16.msra.mxu2 %v3323_v26  ;;  %v4379_v26 = vld [vmem:[#allocation2 + $0x5b4] sm:$0xf0]  ;;  %v3119_v36 = vor.u32 %v4249_v29, %v3116_v30 }
  0x8e   :  { %1516 = vmatpush.bf16.msrb.mxu0 %v3163_v59  ;;  %v3627_v32 = vor.u32 %v4379_v26, %v3626_v25  ;;  %v3084_v59 = vld [vmem:[#allocation2 + $0x178] sm:$0xf0]  ;;  %v3563_v25 = vor.u32 %v4363_v17, %v3562_v16  ;;  %v3546_v26 = vld [vmem:[#allocation2 + $0x508] sm:$0xf] }
  0x8f   :  { %1488 = vmatpush.bf16.msrb.mxu1 %v2907_v52  ;;  %v3594_v52 = vld [vmem:[#allocation2 + $0x568] sm:$0xf]  ;;  %v3356_v17 = vld [vmem:[#allocation2 + $0x398] sm:$0xf0] }
  0x90   :  { %1501 = vmatpush.bf16.msra.mxu3 %v3051_v47  ;;  %v4209_v47 = vld [vmem:[#allocation2 + $0x6c] sm:$0xf]  ;;  %v3595_v62 = vor.u32 %v4371_v53, %v3594_v52  ;;  %v3388_v53 = vld [vmem:[#allocation2 + $0x3d8] sm:$0xf0] }
  0x91   :  { %1529 = vmatpush.bf16.msra.mxu2 %v3307_v41  ;;  %1517 = vmatmul.bf16.vlgmr.msrb.gmra.mxu0 %v4686_v54  ;;  %v4339_v41 = vld [vmem:[#allocation2 + $0x474] sm:$0xf0]  ;;  %v2959_v61 = vor.u32 %v4209_v47, %v2956_v48 }
  0x92   :  { %1572 = vmatpush.bf16.msra.mxu0 %v3675_v2  ;;  %1489 = vmatmul.bf16.vlgmr.msrb.gmra.mxu1 %v4688_v55  ;;  %v3467_v49 = vor.u32 %v4339_v41, %v3466_v40  ;;  %v3260_v40 = vld [vmem:[#allocation2 + $0x2d8] sm:$0xf0]  ;;  %v4229_v41 = vld [vmem:[#allocation2 + $0x10c] sm:$0xf] }
  0x93   :  { %1537 = vmatpush.bf16.msra.mxu1 %v3531_v58  ;;  %v4241_v58 = vld [vmem:[#allocation2 + $0x16c] sm:$0xf]  ;;  %v3039_v52 = vor.u32 %v4229_v41, %v3036_v43  ;;  %v3452_v43 = vld [vmem:[#allocation2 + $0x458] sm:$0xf0] }
  0x94   :  { %1502 = vmatpush.bf16.msra.mxu3 %v3035_v5  ;;  %v3087_v2 = vor.u32 %v4241_v58, %v3084_v59  ;;  %v3434_v5 = vld [vmem:[#allocation2 + $0x428] sm:$0xf]  ;;  %v4281_v59 = vld [vmem:[#allocation2 + $0x2ac] sm:$0xf] }
  0x95   :  { %1530 = vmatpush.bf16.msra.mxu2 %v3291_v0  ;;  %v2940_v0 = vld [vmem:[#allocation2 + $0x58] sm:$0xf0]  ;;  %v4333_v41 = vld [vmem:[#allocation2 + $0x44c] sm:$0xf] }
  0x96   :  { %1593 = vmatpush.bf16.msrb.mxu0 %v3151_v12  ;;  %v2943_v10 = vor.u32 %v4205_v63, %v2940_v0  ;;  %v4201_v12 = vld [vmem:[#allocation2 + $0x2c] sm:$0xf]  ;;  %v3644_v63 = vld [vmem:[#allocation2 + $0x5d8] sm:$0xf0] }
  0x97   :  { %1538 = vmatpush.bf16.msra.mxu1 %v3515_v11  ;;  %1503 = vmatmul.bf16.vlgmr.msra.gmra.mxu3 %v4700_v8  ;;  %v3579_v11 = vor.u32 %v4367_v4, %v3578_v3  ;;  %v2927_v22 = vor.u32 %v4201_v12, %v2924_v13  ;;  %v3372_v4 = vld [vmem:[#allocation2 + $0x3b8] sm:$0xf0] }
  0x98   :  { %1551 = vmatpush.bf16.msrb.mxu3 %v3659_v7  ;;  %1531 = vmatmul.bf16.vlgmr.msra.gmra.mxu2 %v4690_v60  ;;  %v4237_v7 = vld [vmem:[#allocation2 + $0x14c] sm:$0xf]  ;;  %v3628_v12 = vld [vmem:[#allocation2 + $0x5b8] sm:$0xf0] }
  0x99   :  { %1579 = vmatpush.bf16.msrb.mxu2 %v3023_v6  ;;  %v4331_v6 = vld [vmem:[#allocation2 + $0x434] sm:$0xf0]  ;;  %v3071_v15 = vor.u32 %v4237_v7, %v3068_v9  ;;  %v4277_v9 = vld [vmem:[#allocation2 + $0x28c] sm:$0xf] }
  0x9a   :  { %1594 = vmatpush.bf16.msrb.mxu0 %v3135_v24  ;;  %v3435_v14 = vor.u32 %v4331_v6, %v3434_v5  ;;  %v3276_v24 = vld [vmem:[#allocation2 + $0x2f8] sm:$0xf0]  ;;  %v4345_v5 = vld [vmem:[#allocation2 + $0x4ac] sm:$0xf] }
  0x9b   :  { %1539 = vmatpush.bf16.msra.mxu1 %v3499_v23  ;;  %v4289_v23 = vld [vmem:[#allocation2 + $0x2ec] sm:$0xf]  ;;  %v3500_v6 = vld [vmem:[#allocation2 + $0x4b8] sm:$0xf0] }
  0x9c   :  { %1552 = vmatpush.bf16.msrb.mxu3 %v3643_v20  ;;  %v4233_v20 = vld [vmem:[#allocation2 + $0x12c] sm:$0xf]  ;;  %v3279_v34 = vor.u32 %v4289_v23, %v3276_v24 }
  0x9d   :  { %1580 = vmatpush.bf16.msrb.mxu2 %v3007_v19  ;;  %v4327_v19 = vld [vmem:[#allocation2 + $0x414] sm:$0xf0]  ;;  %v3055_v30 = vor.u32 %v4233_v20, %v3052_v21  ;;  %v4273_v21 = vld [vmem:[#allocation2 + $0x26c] sm:$0xf] }
  0x9e   :  { %1595 = vmatpush.bf16.msrb.mxu0 %v3119_v36  ;;  %v3419_v29 = vor.u32 %v4327_v19, %v3418_v18  ;;  %v3532_v36 = vld [vmem:[#allocation2 + $0x4f8] sm:$0xf0]  ;;  %v4341_v18 = vld [vmem:[#allocation2 + $0x48c] sm:$0xf] }
  0x9f   :  { %1540 = vmatpush.bf16.msra.mxu1 %v3483_v35  ;;  %v4353_v35 = vld [vmem:[#allocation2 + $0x4ec] sm:$0xf]  ;;  %v3484_v19 = vld [vmem:[#allocation2 + $0x498] sm:$0xf0] }
  0xa0   :  { %1553 = vmatpush.bf16.msrb.mxu3 %v3627_v32  ;;  %v4321_v32 = vld [vmem:[#allocation2 + $0x3ec] sm:$0xf]  ;;  %v3535_v48 = vor.u32 %v4353_v35, %v3532_v36 }
  0xa1   :  { %1581 = vmatpush.bf16.msrb.mxu2 %v2991_v31  ;;  %3682 = vmatmul.msk.bf16.vlgmr.msra.gmra.mxu0 %vm1281_vm0, %v4710_v50  ;;  %v4359_v31 = vld [vmem:[#allocation2 + $0x514] sm:$0xf0]  ;;  %v3407_v47 = vor.u32 %v4321_v32, %v3404_v33  ;;  %v4373_v23 = vld [vmem:[#allocation2 + $0x58c] sm:$0xf] }
  0xa2   :  { %1596 = vmatpush.bf16.msrb.mxu0 %v3103_v51  ;;  %v3547_v44 = vor.u32 %v4359_v31, %v3546_v26  ;;  %v3263_v51 = vor.u32 %v4285_v38, %v3260_v40  ;;  %v4305_v26 = vld [vmem:[#allocation2 + $0x36c] sm:$0xf]  ;;  %v3324_v40 = vld [vmem:[#allocation2 + $0x358] sm:$0xf0] }
  0xa3   :  { %1541 = vmatpush.bf16.msra.mxu1 %v3467_v49  ;;  %v4317_v49 = vld [vmem:[#allocation2 + $0x3cc] sm:$0xf]  ;;  %v3343_v35 = vor.u32 %v4305_v26, %v3340_v28  ;;  %v4418_v28 = vld [vmem:[#allocation4 + $0xcc] sm:$0xf0] }
  0xa4   :  { %1554 = vmatpush.bf16.msrb.mxu3 %v3611_v46  ;;  %v3660_v46 = vld [vmem:[#allocation2 + $0x5f8] sm:$0xf0]  ;;  %v3391_v0 = vor.u32 %v4317_v49, %v3388_v53  ;;  %v4269_v32 = vld [vmem:[#allocation2 + $0x24c] sm:$0xf] }
  0xa5   :  { %1582 = vmatpush.bf16.msrb.mxu2 %v2975_v45  ;;  %v4385_v45 = vld [vmem:[#allocation2 + $0x5ec] sm:$0xf] }
  0xa6   :  { %1597 = vmatpush.bf16.msrb.mxu0 %v3087_v2  ;;  %v3663_v58 = vor.u32 %v4385_v45, %v3660_v46  ;;  %v4313_v2 = vld [vmem:[#allocation2 + $0x3ac] sm:$0xf]  ;;  %v3180_v46 = vld [vmem:[#allocation2 + $0x238] sm:$0xf0] }
  0xa7   :  { %1542 = vmatpush.bf16.msra.mxu1 %v3451_v1  ;;  %v3519_v1 = vor.u32 %v4349_v56, %v3516_v57  ;;  %v3375_v13 = vor.u32 %v4313_v2, %v3372_v4  ;;  %v4369_v33 = vld [vmem:[#allocation2 + $0x56c] sm:$0xf]  ;;  %v3308_v57 = vld [vmem:[#allocation2 + $0x338] sm:$0xf0] }
  0xa8   :  { %1555 = vmatpush.bf16.msrb.mxu3 %v3595_v62  ;;  %v4381_v62 = vld [vmem:[#allocation2 + $0x5cc] sm:$0xf]  ;;  %v3564_v2 = vld [vmem:[#allocation2 + $0x538] sm:$0xf0] }
  0xa9   :  { %1583 = vmatpush.bf16.msrb.mxu2 %v2959_v61  ;;  %v3244_v61 = vld [vmem:[#allocation2 + $0x2b8] sm:$0xf0]  ;;  %v3647_v7 = vor.u32 %v4381_v62, %v3644_v63  ;;  %v4301_v38 = vld [vmem:[#allocation2 + $0x34c] sm:$0xf] }
  0xaa   :  { %1598 = vmatpush.bf16.msrb.mxu0 %v3071_v15  ;;  %v3247_v3 = vor.u32 %v4281_v59, %v3244_v61  ;;  %v4309_v15 = vld [vmem:[#allocation2 + $0x38c] sm:$0xf]  ;;  %v3327_v49 = vor.u32 %v4301_v38, %v3324_v40  ;;  %v3436_v59 = vld [vmem:[#allocation2 + $0x438] sm:$0xf0]  ;;  %v3766_v38 = vld [vmem:[#allocation4 + $0xa0] sm:$0xf] }
  0xab   :  { %1543 = vmatpush.bf16.msra.mxu1 %v3435_v14  ;;  %v3503_v14 = vor.u32 %v4345_v5, %v3500_v6  ;;  %v3359_v24 = vor.u32 %v4309_v15, %v3356_v17  ;;  %v4265_v45 = vld [vmem:[#allocation2 + $0x22c] sm:$0xf]  ;;  %v3676_v4 = vld [vmem:[#allocation2 + $0x618] sm:$0xf0]  ;;  %v4422_v17 = vld [vmem:[#allocation4 + $0xec] sm:$0xf0] }
  0xac   :  { %1556 = vmatpush.bf16.msrb.mxu3 %v3579_v11  ;;  %v4377_v11 = vld [vmem:[#allocation2 + $0x5ac] sm:$0xf]  ;;  %v3183_v56 = vor.u32 %v4265_v45, %v3180_v46 }
  0xad   :  { %1584 = vmatpush.bf16.msrb.mxu2 %v2943_v10  ;;  %v3228_v10 = vld [vmem:[#allocation2 + $0x298] sm:$0xf0]  ;;  %v3631_v20 = vor.u32 %v4377_v11, %v3628_v12  ;;  %v4261_v63 = vld [vmem:[#allocation2 + $0x20c] sm:$0xf] }
  0xae   :  { %1599 = vmatpush.bf16.msrb.mxu0 %v3055_v30  ;;  %v3231_v16 = vor.u32 %v4277_v9, %v3228_v10  ;;  %v3468_v30 = vld [vmem:[#allocation2 + $0x478] sm:$0xf0]  ;;  %v4755_v9 = vld [vmem:[%s4836_s2] sm:$0xf] }
  0xaf   :  { %1544 = vmatpush.bf16.msra.mxu1 %v3419_v29  ;;  %v4337_v29 = vld [vmem:[#allocation2 + $0x46c] sm:$0xf]  ;;  %v3292_v12 = vld [vmem:[#allocation2 + $0x318] sm:$0xf0] }
  0xb0   :  { %1557 = vmatpush.bf16.msrb.mxu3 %v3563_v25  ;;  %v3487_v25 = vor.u32 %v4341_v18, %v3484_v19  ;;  %v3471_v36 = vor.u32 %v4337_v29, %v3468_v30  ;;  %v4357_v18 = vld [vmem:[#allocation2 + $0x50c] sm:$0xf] }
  0xb1   :  { %1585 = vmatpush.bf16.msrb.mxu2 %v2927_v22  ;;  %v3212_v22 = vld [vmem:[#allocation2 + $0x278] sm:$0xf0]  ;;  %v1294_v53 = vpop.f32.mrf.mxu0 }
  0xb2   :  { %1545 = vmatmul.bf16.vlgmr.msra.gmra.mxu1 %v4726_v37  ;;  %1600 = vmatpush.bf16.msrb.mxu0 %v3039_v52  ;;  %v3215_v27 = vor.u32 %v4273_v21, %v3212_v22  ;;  %v4297_v52 = vld [vmem:[#allocation2 + $0x32c] sm:$0xf]  ;;  %v3926_v21 = vld [vmem:[#allocation4 + $0x1e0] sm:$0xf]  ;;  %v4454_v22 = vld [vmem:[#allocation4 + $0x1ec] sm:$0xf0] }
  0xb3   :  { %1607 = vmatpush.bf16.msrb.mxu1 %v3279_v34  ;;  %v3596_v34 = vld [vmem:[#allocation2 + $0x578] sm:$0xf0]  ;;  %v3311_v5 = vor.u32 %v4297_v52, %v3308_v57  ;;  %v3927_v29 = vor.u32 %v4454_v22, %v3926_v21  ;;  %v3878_v52 = vld [vmem:[#allocation4 + $0x180] sm:$0xf]  ;;  %v4430_v21 = vld [vmem:[#allocation4 + $0x12c] sm:$0xf0] }
  0xb4   :  { %1558 = vmatpush.bf16.msrb.mxu3 %v3547_v44  ;;  %v3599_v44 = vor.u32 %v4369_v33, %v3596_v34 }
  0xb5   :  { %1586 = vmatpush.bf16.msrb.mxu2 %v2911_v39  ;;  %1601 = vmatmul.bf16.vlgmr.msrb.gmra.mxu0 %v4700_v8  ;;  %v3196_v8 = vld [vmem:[#allocation2 + $0x258] sm:$0xf0]  ;;  %v4750_v61 = vpop.f32.mrf.mxu1 }
  0xb6   :  { %1649 = vmatpush.bf16.msra.mxu0 %v3663_v58  ;;  %v3199_v39 = vor.u32 %v4269_v32, %v3196_v8  ;;  %v4329_v58 = vld [vmem:[#allocation2 + $0x42c] sm:$0xf]  ;;  %v4757_v10 = vpop.f32.mrf.mxu2  ;;  %v4450_v32 = vld [vmem:[#allocation4 + $0x1cc] sm:$0xf0] }
  0xb7   :  { %1608 = vmatpush.bf16.msrb.mxu1 %v3263_v51  ;;  %1559 = vmatmul.bf16.vlgmr.msrb.gmra.mxu3 %v4728_v42  ;;  %v3455_v51 = vor.u32 %v4333_v41, %v3452_v43  ;;  %v3439_v6 = vor.u32 %v4329_v58, %v3436_v59  ;;  %v3894_v43 = vld [vmem:[#allocation4 + $0x1a0] sm:$0xf]  ;;  %v4406_v59 = vld [vmem:[#allocation4 + $0x6c] sm:$0xf0] }
  0xb8   :  { %1621 = vmatpush.bf16.msra.mxu3 %v3407_v47  ;;  %1587 = vmatmul.bf16.vlgmr.msrb.gmra.mxu2 %v4688_v55  ;;  %v3612_v55 = vld [vmem:[#allocation2 + $0x598] sm:$0xf0]  ;;  %v4365_v47 = vld [vmem:[#allocation2 + $0x54c] sm:$0xf]  ;;  %v1336_v33 = vpop.f32.mrf.mxu3  ;;  %v3734_v58 = vld [vmem:[#allocation4 + $0x60] sm:$0xf] }
  0xb9   :  { %1635 = vmatpush.bf16.msra.mxu2 %v3535_v48  ;;  %v3615_v31 = vor.u32 %v4373_v23, %v3612_v55  ;;  %v3580_v48 = vld [vmem:[#allocation2 + $0x558] sm:$0xf0]  ;;  %v1296_v30 = vpop.f32.mrf.mxu0 }
  0xba   :  { %1650 = vmatpush.bf16.msra.mxu0 %v3647_v7  ;;  %v3583_v62 = vor.u32 %v4365_v47, %v3580_v48  ;;  %v4293_v7 = vld [vmem:[#allocation2 + $0x30c] sm:$0xf]  ;;  %v3750_v47 = vld [vmem:[#allocation4 + $0x80] sm:$0xf]  ;;  %v4410_v48 = vld [vmem:[#allocation4 + $0x8c] sm:$0xf0] }
  0xbb   :  { %1609 = vmatpush.bf16.msrb.mxu1 %v3247_v3  ;;  %v4389_v3 = vld [vmem:[#allocation2 + $0x60c] sm:$0xf]  ;;  %v3295_v23 = vor.u32 %v4293_v7, %v3292_v12 }
  0xbc   :  { %1622 = vmatpush.bf16.msra.mxu3 %v3391_v0  ;;  %v3164_v0 = vld [vmem:[#allocation2 + $0x218] sm:$0xf0]  ;;  %v3679_v19 = vor.u32 %v4389_v3, %v3676_v4  ;;  %v3718_v4 = vld [vmem:[#allocation4 + $0x40] sm:$0xf] }
  0xbd   :  { %1636 = vmatpush.bf16.msra.mxu2 %v3519_v1  ;;  %v4361_v1 = vld [vmem:[#allocation2 + $0x52c] sm:$0xf]  ;;  %v3167_v11 = vor.u32 %v4261_v63, %v3164_v0  ;;  %v1310_v8 = vpop.f32.mrf.mxu1  ;;  %v3862_v63 = vld [vmem:[#allocation4 + $0x160] sm:$0xf]  ;;  %v4438_v0 = vld [vmem:[#allocation4 + $0x16c] sm:$0xf0] }
  0xbe   :  { %1651 = vmatpush.bf16.msra.mxu0 %v3631_v20  ;;  %v3567_v15 = vor.u32 %v4361_v1, %v3564_v2  ;;  %v3548_v20 = vld [vmem:[#allocation2 + $0x518] sm:$0xf0]  ;;  %v1324_v41 = vpop.f32.mrf.mxu2  ;;  %v3735_v1 = vor.u32 %v4406_v59, %v3734_v58  ;;  %v4482_v58 = vld [vmem:[#allocation4 + $0x2cc] sm:$0xf0]  ;;  %v4408_v59 = vld [vmem:[#allocation4 + $0x84] sm:$0xf] }
  0xbf   :  { %1610 = vmatpush.bf16.msrb.mxu1 %v3231_v16  ;;  %v3798_v16 = vld [vmem:[#allocation4 + $0xe0] sm:$0xf]  ;;  %v3551_v26 = vor.u32 %v4357_v18, %v3548_v20  ;;  %v4398_v18 = vld [vmem:[#allocation4 + $0x2c] sm:$0xf0] }
  0xc0   :  { %1623 = vmatpush.bf16.msra.mxu3 %v3375_v13  ;;  %v4325_v13 = vld [vmem:[#allocation2 + $0x40c] sm:$0xf]  ;;  %v3830_v20 = vld [vmem:[#allocation4 + $0x120] sm:$0xf] }
  0xc1   :  { %1637 = vmatpush.bf16.msra.mxu2 %v3503_v14  ;;  %v3420_v14 = vld [vmem:[#allocation2 + $0x418] sm:$0xf0] }
  0xc2   :  { %1652 = vmatpush.bf16.msra.mxu0 %v3615_v31  ;;  %v3423_v55 = vor.u32 %v4325_v13, %v3420_v14  ;;  %v3910_v31 = vld [vmem:[#allocation4 + $0x1c0] sm:$0xf] }
  0xc3   :  { %1611 = vmatpush.bf16.msrb.mxu1 %v3215_v27  ;;  %v3782_v27 = vld [vmem:[#allocation4 + $0xc0] sm:$0xf]  ;;  %v3911_v40 = vor.u32 %v4450_v32, %v3910_v31  ;;  %v4452_v32 = vld [vmem:[#allocation4 + $0x1e4] sm:$0xf] }
  0xc4   :  { %1624 = vmatpush.bf16.msra.mxu3 %v3359_v24  ;;  %v3799_v24 = vor.u32 %v4422_v17, %v3798_v16  ;;  %v3783_v34 = vor.u32 %v4418_v28, %v3782_v27  ;;  %v3702_v17 = vld [vmem:[#allocation4 + $0x20] sm:$0xf]  ;;  %v4420_v27 = vld [vmem:[#allocation4 + $0xe4] sm:$0xf]  ;;  %v3800_v28 = vld [vmem:[#allocation4 + $0xf0] sm:$0xf0] }
  0xc5   :  { %1638 = vmatpush.bf16.msra.mxu2 %v3487_v25  ;;  %v293_v25 = vperm.slane %v4755_v9, 0 }
  0xc6   :  { %1653 = vmatpush.bf16.msra.mxu0 %v3599_v44  ;;  %v4446_v44 = vld [vmem:[#allocation4 + $0x1ac] sm:$0xf0] }
  0xc7   :  { %1612 = vmatpush.bf16.msrb.mxu1 %v3199_v39  ;;  %v4414_v39 = vld [vmem:[#allocation4 + $0xac] sm:$0xf0] }
  0xc8   :  { %1625 = vmatpush.bf16.msra.mxu3 %v3343_v35  ;;  %v1295_v35 = vadd.f32 %v1294_v53, %v293_v25  ;;  %v4442_v53 = vld [vmem:[#allocation4 + $0x18c] sm:$0xf0] }
  0xc9   :  { %1639 = vmatpush.bf16.msra.mxu2 %v3471_v36  ;;  %v1297_v36 = vadd.f32 %v1296_v30, %v293_v25  ;;  %v3686_v25 = vld [vmem:[#allocation4] sm:$0xf]  ;;  %v4426_v30 = vld [vmem:[#allocation4 + $0x10c] sm:$0xf0] }
  0xca   :  { %1654 = vmatpush.bf16.msra.mxu0 %v3583_v62  ;;  %v1309_v45 = vadd.f32 %v4750_v61, %v1295_v35  ;;  %v1338_v62 = vpop.f32.mrf.mxu3  ;;  %v1378_v61 = vpop.f32.mrf.mxu2 }
  0xcb   :  { %1613 = vmatpush.bf16.msrb.mxu1 %v3183_v56  ;;  %v1311_v46 = vadd.f32 %v1310_v8, %v1297_v36  ;;  %v3928_v8 = vld [vmem:[#allocation4 + $0x1f0] sm:$0xf0]  ;;  %v3803_v36 = vor.u32 %v4420_v27, %v3800_v28  ;;  %v3990_v27 = vld [vmem:[#allocation4 + $0x260] sm:$0xf]  ;;  %v4396_v28 = vld [vmem:[#allocation4 + $0x24] sm:$0xf] }
  0xcc   :  { %1626 = vmatpush.bf16.msra.mxu3 %v3327_v49  ;;  %v3895_v49 = vor.u32 %v4446_v44, %v3894_v43  ;;  %v1323_v57 = vadd.f32 %v4757_v10, %v1309_v45  ;;  %v4434_v10 = vld [vmem:[#allocation4 + $0x14c] sm:$0xf0]  ;;  %v4448_v44 = vld [vmem:[#allocation4 + $0x1c4] sm:$0xf] }
  0xcd   :  { %1640 = vmatpush.bf16.msra.mxu2 %v3455_v51 }
  0xce   :  { %1655 = vmatpush.bf16.msra.mxu0 %v3567_v15  ;;  %v1350_v51 = vpop.f32.mrf.mxu0  ;;  %v1337_v2 = vadd.f32 %v1336_v33, %v1323_v57 }
  0xcf   :  { %1614 = vmatpush.bf16.msrb.mxu1 %v3167_v11  ;;  %v1364_v56 = vpop.f32.mrf.mxu1  ;;  %v3846_v11 = vld [vmem:[#allocation4 + $0x140] sm:$0xf] }
  0xd0   :  { %1627 = vmatpush.bf16.msra.mxu3 %v3311_v5  ;;  %v4402_v5 = vld [vmem:[#allocation4 + $0x4c] sm:$0xf0]  ;;  %v1351_v12 = vadd.f32 %v1350_v51, %v1337_v2  ;;  %v3768_v51 = vld [vmem:[#allocation4 + $0xb0] sm:$0xf0] }
  0xd1   :  { %1641 = vmatpush.bf16.msra.mxu2 %v3439_v6  ;;  %v3863_v6 = vor.u32 %v4438_v0, %v3862_v63  ;;  %v3719_v15 = vor.u32 %v4402_v5, %v3718_v4  ;;  %v3880_v2 = vld [vmem:[#allocation4 + $0x190] sm:$0xf0]  ;;  %v4022_v4 = vld [vmem:[#allocation4 + $0x2a0] sm:$0xf]  ;;  %v4478_v5 = vld [vmem:[#allocation4 + $0x2ac] sm:$0xf0] }
  0xd2   :  { %1615 = vmatmul.bf16.vlgmr.msrb.gmra.mxu1 %v4686_v54  ;;  %1656 = vmatpush.bf16.msra.mxu0 %v3551_v26  ;;  %v3767_v54 = vor.u32 %v4414_v39, %v3766_v38  ;;  %v1365_v22 = vadd.f32 %v1364_v56, %v1351_v12  ;;  %v4394_v26 = vld [vmem:[#allocation4 + $0xc] sm:$0xf0]  ;;  %v4416_v39 = vld [vmem:[#allocation4 + $0xc4] sm:$0xf] }
  0xd3   :  { %1670 = vmatpush.bf16.msra.mxu1 %v3679_v19  ;;  %v3847_v19 = vor.u32 %v4434_v10, %v3846_v11  ;;  %v3687_v33 = vor.u32 %v4394_v26, %v3686_v25  ;;  %v4444_v56 = vld [vmem:[#allocation4 + $0x1a4] sm:$0xf]  ;;  %v4023_v10 = vor.u32 %v4478_v5, %v4022_v4 }
  0xd4   :  { %1628 = vmatpush.bf16.msra.mxu3 %v3295_v23  ;;  %v1380_v23 = vpop.f32.mrf.mxu2  ;;  %v1379_v31 = vadd.f32 %v1378_v61, %v1365_v22  ;;  %v4436_v12 = vld [vmem:[#allocation4 + $0x164] sm:$0xf] }
  0xd5   :  { %1642 = vmatpush.bf16.msra.mxu2 %v3423_v55  ;;  %1657 = vmatmul.bf16.vlgmr.msra.gmra.mxu0 %v4728_v42  ;;  %v3879_v42 = vor.u32 %v4442_v53, %v3878_v52  ;;  %v3703_v55 = vor.u32 %v4398_v18, %v3702_v17  ;;  %v3720_v17 = vld [vmem:[#allocation4 + $0x50] sm:$0xf0]  ;;  %v4432_v22 = vld [vmem:[#allocation4 + $0x144] sm:$0xf] }
  0xd6   :  { %v1352_v7 = vpop.f32.mrf.mxu0  ;;  %v4768_v35 = vpop.f32.mrf.mxu3  ;;  %v1677_v43 = vmax.f32 %v1379_v31, 0.0 }
  0xd7   :  { %2481 = vmatpush.bf16.msrb.mxu1 %v3927_v29  ;;  %1629 = vmatmul.bf16.vlgmr.msra.gmra.mxu3 %v4690_v60  ;;  %v3751_v60 = vor.u32 %v4410_v48, %v3750_v47  ;;  %v1366_v14 = vpop.f32.mrf.mxu1  ;;  %v3814_v29 = vld [vmem:[#allocation4 + $0x100] sm:$0xf]  ;;  %v4486_v48 = vld [vmem:[#allocation4 + $0x2ec] sm:$0xf0] }
  0xd8   :  { %2467 = vmatpush.bf16.msrb.mxu3 %v3799_v24  ;;  %1643 = vmatmul.bf16.vlgmr.msra.gmra.mxu2 %v4726_v37  ;;  %v1325_v37 = vadd.f32 %v1324_v41, %v1311_v46  ;;  %v3815_v38 = vor.u32 %v4426_v30, %v3814_v29  ;;  %v3931_v41 = vor.u32 %v4452_v32, %v3928_v8  ;;  %v4054_v47 = vld [vmem:[#allocation4 + $0x2e0] sm:$0xf]  ;;  %v3704_v29 = vld [vmem:[#allocation4 + $0x30] sm:$0xf0]  ;;  %v4428_v8 = vld [vmem:[#allocation4 + $0x124] sm:$0xf] }
  0xd9   :  { %v4055_v53 = vor.u32 %v4486_v48, %v4054_v47  ;;  %v4423_v48 = vld [vmem:[#allocation4 + $0xf4] sm:$0xf0] }
  0xda   :  { %v1339_v3 = vadd.f32 %v1338_v62, %v1325_v37  ;;  %v4038_v37 = vld [vmem:[#allocation4 + $0x2c0] sm:$0xf] }
  0xdb   :  { %2482 = vmatpush.bf16.msrb.mxu1 %v3911_v40  ;;  %v3784_v40 = vld [vmem:[#allocation4 + $0xd0] sm:$0xf0]  ;;  %2495 = vmatpush.bf16.msrb.mxu2 %v4055_v53  ;;  %v4039_v61 = vor.u32 %v4482_v58, %v4038_v37  ;;  %v4462_v37 = vld [vmem:[#allocation4 + $0x22c] sm:$0xf0] }
  0xdc   :  { %2468 = vmatpush.bf16.msrb.mxu3 %v3783_v34  ;;  %v1353_v13 = vadd.f32 %v1352_v7, %v1339_v3  ;;  %v3787_v46 = vor.u32 %v4416_v39, %v3784_v40  ;;  %v1406_v63 = vpop.f32.mrf.mxu2  ;;  %v3736_v7 = vld [vmem:[#allocation4 + $0x70] sm:$0xf0]  ;;  %v3974_v39 = vld [vmem:[#allocation4 + $0x240] sm:$0xf]  ;;  %v4466_v40 = vld [vmem:[#allocation4 + $0x24c] sm:$0xf0] }
  0xde   :  { %v1367_v16 = vadd.f32 %v1366_v14, %v1353_v13  ;;  %v1394_v0 = vpop.f32.mrf.mxu3  ;;  %v3864_v13 = vld [vmem:[#allocation4 + $0x170] sm:$0xf0] }
  0xdf   :  { %2483 = vmatpush.bf16.msrb.mxu1 %v3895_v49  ;;  %v4412_v49 = vld [vmem:[#allocation4 + $0xa4] sm:$0xf]  ;;  %2496 = vmatpush.bf16.msrb.mxu2 %v4039_v61  ;;  %v3867_v18 = vor.u32 %v4436_v12, %v3864_v13  ;;  %v3790_v61 = vld [vmem:[#allocation4 + $0xc8] sm:$0xf]  ;;  %v4415_v13 = vld [vmem:[#allocation4 + $0xb4] sm:$0xf0] }
  0xe0   :  { %2469 = vmatpush.bf16.msrb.mxu3 %v3767_v54  ;;  %v1381_v24 = vadd.f32 %v1380_v23, %v1367_v16  ;;  %v3912_v54 = vld [vmem:[#allocation4 + $0x1d0] sm:$0xf0]  ;;  %v3771_v57 = vor.u32 %v4412_v49, %v3768_v51  ;;  %v4400_v16 = vld [vmem:[#allocation4 + $0x44] sm:$0xf]  ;;  %v3774_v12 = vld [vmem:[#allocation4 + $0xa8] sm:$0xf] }
  0xe1   :  { %v3915_v52 = vor.u32 %v4448_v44, %v3912_v54  ;;  %v3848_v23 = vld [vmem:[#allocation4 + $0x150] sm:$0xf0]  ;;  %v3723_v26 = vor.u32 %v4400_v16, %v3720_v17  ;;  %v3806_v44 = vld [vmem:[#allocation4 + $0xe8] sm:$0xf]  ;;  %v4424_v49 = vld [vmem:[#allocation4 + $0x104] sm:$0xf] }
  0xe2   :  { %3683 = vmatmul.msk.bf16.vlgmr.msra.gmra.mxu1 %vm1281_vm0, %v4710_v50  ;;  %v3831_v50 = vor.u32 %v4430_v21, %v3830_v20  ;;  %v1681_v34 = vmax.f32 %v1381_v24, 0.0  ;;  %v294_v24 = vperm.slane %v4755_v9, 1  ;;  %v3851_v30 = vor.u32 %v4432_v22, %v3848_v23  ;;  %v3816_v51 = vld [vmem:[#allocation4 + $0x110] sm:$0xf0] }
  0xe3   :  { %2484 = vmatpush.bf16.msrb.mxu1 %v3879_v42  ;;  %v3752_v42 = vld [vmem:[#allocation4 + $0x90] sm:$0xf0]  ;;  %2497 = vmatpush.bf16.msrb.mxu2 %v4023_v10 }
  0xe4   :  { %2470 = vmatpush.bf16.msrb.mxu3 %v3751_v60  ;;  %v4770_v45 = vpack.c.bf16 %v1681_v34, %v1677_v43  ;;  %v3896_v60 = vld [vmem:[#allocation4 + $0x1b0] sm:$0xf0]  ;;  %v3755_v3 = vor.u32 %v4408_v59, %v3752_v42  ;;  %v1408_v25 = vpop.f32.mrf.mxu2  ;;  %v1393_v34 = vadd.f32 %v4768_v35, %v294_v24  ;;  %v3807_v59 = vor.u32 %v4423_v48, %v3806_v44  ;;  %v3726_v44 = vld [vmem:[#allocation4 + $0x48] sm:$0xf]  ;;  %v4403_v48 = vld [vmem:[#allocation4 + $0x54] sm:$0xf0] }
  0xe5   :  { %v3899_v62 = vor.u32 %v4444_v56, %v3896_v60  ;;  %v3688_v43 = vld [vmem:[#allocation4 + $0x10] sm:$0xf0]  ;;  %v3819_v42 = vor.u32 %v4424_v49, %v3816_v51  ;;  %v4472_v49 = vld [vmem:[#allocation4 + $0x284] sm:$0xf] }
  0xe6   :  { %v4040_v22 = vld [vmem:[#allocation4 + $0x2d0] sm:$0xf0] }
  0xe7   :  { %2485 = vmatpush.bf16.msrb.mxu1 %v3863_v6  ;;  %v4404_v6 = vld [vmem:[#allocation4 + $0x64] sm:$0xf] }
  0xe8   :  { %2471 = vmatpush.bf16.msrb.mxu3 %v3735_v1  ;;  %v4440_v1 = vld [vmem:[#allocation4 + $0x184] sm:$0xf]  ;;  %v3739_v14 = vor.u32 %v4404_v6, %v3736_v7 }
  0xe9   :  { %v3883_v11 = vor.u32 %v4440_v1, %v3880_v2  ;;  %v4484_v7 = vld [vmem:[#allocation4 + $0x2e4] sm:$0xf] }
  0xeb   :  { %2486 = vmatpush.bf16.msrb.mxu1 %v3847_v19  ;;  %v4474_v19 = vld [vmem:[#allocation4 + $0x28c] sm:$0xf0] }
  0xec   :  { %2472 = vmatpush.bf16.msrb.mxu3 %v3719_v15  ;;  %v4006_v15 = vld [vmem:[#allocation4 + $0x280] sm:$0xf] }
  0xee   :  { %v1420_v20 = vpop.f32.mrf.mxu0 }
  0xef   :  { %2487 = vmatpush.bf16.msrb.mxu1 %v3831_v50  ;;  %v4470_v50 = vld [vmem:[#allocation4 + $0x26c] sm:$0xf0]  ;;  %v1434_v32 = vpop.f32.mrf.mxu1 }
  0xf0   :  { %2473 = vmatpush.bf16.msrb.mxu3 %v3703_v55  ;;  %v4007_v55 = vor.u32 %v4474_v19, %v4006_v15  ;;  %v3991_v31 = vor.u32 %v4470_v50, %v3990_v27  ;;  %v3758_v19 = vld [vmem:[#allocation4 + $0x88] sm:$0xf] }
  0xf2   :  { %2498 = vmatpush.bf16.msrb.mxu2 %v4007_v55  ;;  %v4411_v55 = vld [vmem:[#allocation4 + $0x94] sm:$0xf0] }
  0xf3   :  { %2488 = vmatpush.bf16.msrb.mxu1 %v3815_v38  ;;  %v3707_v38 = vor.u32 %v4396_v28, %v3704_v29  ;;  %v3759_v29 = vor.u32 %v4411_v55, %v3758_v19  ;;  %v4502_v19 = vld [vmem:[#allocation4 + $0x36c] sm:$0xf0]  ;;  %v3808_v55 = vld [vmem:[#allocation4 + $0xf8] sm:$0xf0] }
  0xf4   :  { %2474 = vmatpush.bf16.msrb.mxu3 %v3687_v33  ;;  %v3832_v33 = vld [vmem:[#allocation4 + $0x130] sm:$0xf0] }
  0xf5   :  { %v3835_v54 = vor.u32 %v4428_v8, %v3832_v33  ;;  %v4407_v33 = vld [vmem:[#allocation4 + $0x74] sm:$0xf0] }
  0xf6   :  { %v4773_v21 = vpop.f32.mrf.mxu3  ;;  %2499 = vmatpush.bf16.msrb.mxu2 %v3991_v31  ;;  %v1422_v56 = vpop.f32.mrf.mxu0  ;;  %v4476_v31 = vld [vmem:[#allocation4 + $0x2a4] sm:$0xf] }
  0xf7   :  { %2537 = vmatpush.bf16.msra.mxu1 %v3931_v41  ;;  %2475 = vmatmul.bf16.vlgmr.msrb.gmra.mxu3 %v4770_v45  ;;  %v4392_v41 = vld [vmem:[#allocation4 + $0x4] sm:$0xf]  ;;  %v1436_v2 = vpop.f32.mrf.mxu1 }
  0xf8   :  { %2523 = vmatpush.bf16.msra.mxu3 %v3803_v36  ;;  %v1395_v36 = vadd.f32 %v1394_v0, %v294_v24  ;;  %v3691_v60 = vor.u32 %v4392_v41, %v3688_v43  ;;  %v4419_v0 = vld [vmem:[#allocation4 + $0xd4] sm:$0xf0] }
  0xf9   :  { %v3791_v5 = vor.u32 %v4419_v0, %v3790_v61  ;;  %v4455_v41 = vld [vmem:[#allocation4 + $0x1f4] sm:$0xf0]  ;;  %v3992_v61 = vld [vmem:[#allocation4 + $0x270] sm:$0xf0] }
  0xfa   :  { %v1409_v53 = vadd.f32 %v1408_v25, %v1395_v36  ;;  %v4182_v25 = vld [vmem:[#allocation4 + $0x3e0] sm:$0xf] }
  0xfb   :  { %2538 = vmatpush.bf16.msra.mxu1 %v3915_v52  ;;  %v1407_v52 = vadd.f32 %v1406_v63, %v1393_v34  ;;  %v1462_v35 = vpop.f32.mrf.mxu2  ;;  %v3942_v63 = vld [vmem:[#allocation4 + $0x200] sm:$0xf] }
  0xfc   :  { %2524 = vmatpush.bf16.msra.mxu3 %v3787_v46  ;;  %v3975_v46 = vor.u32 %v4466_v40, %v3974_v39  ;;  %v1423_v1 = vadd.f32 %v1422_v56, %v1409_v53  ;;  %v4166_v36 = vld [vmem:[#allocation4 + $0x3c0] sm:$0xf]  ;;  %v3934_v40 = vld [vmem:[#allocation4 + $0x1e8] sm:$0xf]  ;;  %v4510_v56 = vld [vmem:[#allocation4 + $0x3ac] sm:$0xf0] }
  0xfd   :  { %v1421_v58 = vadd.f32 %v1420_v20, %v1407_v52  ;;  %v4480_v20 = vld [vmem:[#allocation4 + $0x2c4] sm:$0xf]  ;;  %v3935_v51 = vor.u32 %v4455_v41, %v3934_v40  ;;  %v4008_v52 = vld [vmem:[#allocation4 + $0x290] sm:$0xf0]  ;;  %v4150_v53 = vld [vmem:[#allocation4 + $0x3a0] sm:$0xf] }
  0xfe   :  { %v1450_v47 = vpop.f32.mrf.mxu3  ;;  %2500 = vmatpush.bf16.msrb.mxu2 %v3975_v46  ;;  %v1437_v16 = vadd.f32 %v1436_v2, %v1423_v1  ;;  %v4043_v24 = vor.u32 %v4480_v20, %v4040_v22  ;;  %v4399_v1 = vld [vmem:[#allocation4 + $0x34] sm:$0xf0] }
  0xff   :  { %2539 = vmatpush.bf16.msra.mxu1 %v3899_v62  ;;  %v1435_v4 = vadd.f32 %v1434_v32, %v1421_v58  ;;  %v4024_v32 = vld [vmem:[#allocation4 + $0x2b0] sm:$0xf0]  ;;  %v4151_v58 = vor.u32 %v4510_v56, %v4150_v53  ;;  %v4443_v22 = vld [vmem:[#allocation4 + $0x194] sm:$0xf0]  ;;  %v295_v53 = vperm.slane %v4755_v9, 2 }
 0x100   :  { %2525 = vmatpush.bf16.msra.mxu3 %v3771_v57  ;;  %v3958_v57 = vld [vmem:[#allocation4 + $0x220] sm:$0xf]  ;;  %v1451_v17 = vadd.f32 %v1450_v47, %v1437_v16  ;;  %v4027_v34 = vor.u32 %v4476_v31, %v4024_v32  ;;  %v3886_v16 = vld [vmem:[#allocation4 + $0x188] sm:$0xf]  ;;  %v4439_v31 = vld [vmem:[#allocation4 + $0x174] sm:$0xf0] }
 0x101   :  { %v3959_v62 = vor.u32 %v4462_v37, %v3958_v57  ;;  %v1449_v15 = vadd.f32 %v4773_v21, %v1435_v4  ;;  %v4451_v57 = vld [vmem:[#allocation4 + $0x1d4] sm:$0xf0]  ;;  %v4011_v37 = vor.u32 %v4472_v49, %v4008_v52  ;;  %v3902_v4 = vld [vmem:[#allocation4 + $0x1a8] sm:$0xf]  ;;  %v4417_v32 = vld [vmem:[#allocation4 + $0xcc] sm:$0xf] }
 0x102   :  { %v3776_v49 = vld [vmem:[#allocation4 + $0xb8] sm:$0xf0] }
 0x103   :  { %2540 = vmatpush.bf16.msra.mxu1 %v3883_v11  ;;  %2501 = vmatpush.bf16.msrb.mxu2 %v3959_v62  ;;  %v4056_v11 = vld [vmem:[#allocation4 + $0x2f0] sm:$0xf0]  ;;  %v1464_v23 = vpop.f32.mrf.mxu2  ;;  %v1463_v27 = vadd.f32 %v1462_v35, %v1449_v15  ;;  %v4468_v62 = vld [vmem:[#allocation4 + $0x264] sm:$0xf] }
 0x104   :  { %2526 = vmatpush.bf16.msra.mxu3 %v3755_v3  ;;  %v4458_v3 = vld [vmem:[#allocation4 + $0x20c] sm:$0xf0]  ;;  %v1465_v28 = vadd.f32 %v1464_v23, %v1451_v17  ;;  %v3995_v2 = vor.u32 %v4468_v62, %v3992_v61  ;;  %v4421_v23 = vld [vmem:[#allocation4 + $0xec] sm:$0xf]  ;;  %v3760_v61 = vld [vmem:[#allocation4 + $0x98] sm:$0xf0] }
 0x105   :  { %v3943_v6 = vor.u32 %v4458_v3, %v3942_v63  ;;  %v4134_v63 = vld [vmem:[#allocation4 + $0x380] sm:$0xf]  ;;  %v4506_v3 = vld [vmem:[#allocation4 + $0x38c] sm:$0xf0] }
 0x106   :  { %v1476_v10 = vpop.f32.mrf.mxu3  ;;  %v4490_v62 = vld [vmem:[#allocation4 + $0x30c] sm:$0xf0] }
 0x107   :  { %2541 = vmatpush.bf16.msra.mxu1 %v3867_v18  ;;  %2502 = vmatpush.bf16.msrb.mxu2 %v3943_v6  ;;  %v3775_v18 = vor.u32 %v4415_v13, %v3774_v12  ;;  %v1477_v21 = vadd.f32 %v1476_v10, %v1463_v27  ;;  %v4135_v6 = vor.u32 %v4506_v3, %v4134_v63  ;;  %v4395_v12 = vld [vmem:[#allocation4 + $0x14] sm:$0xf0]  ;;  %v4464_v13 = vld [vmem:[#allocation4 + $0x244] sm:$0xf]  ;;  %v3960_v27 = vld [vmem:[#allocation4 + $0x230] sm:$0xf0] }
 0x108   :  { %2527 = vmatpush.bf16.msra.mxu3 %v3739_v14  ;;  %v4059_v14 = vor.u32 %v4484_v7, %v4056_v11  ;;  %v3694_v11 = vld [vmem:[#allocation4 + $0x8] sm:$0xf] }
 0x10b   :  { %2542 = vmatpush.bf16.msra.mxu1 %v3851_v30  ;;  %2551 = vmatpush.bf16.msra.mxu2 %v4059_v14  ;;  %v3742_v30 = vld [vmem:[#allocation4 + $0x68] sm:$0xf]  ;;  %v3976_v14 = vld [vmem:[#allocation4 + $0x250] sm:$0xf0] }
 0x10c   :  { %2528 = vmatpush.bf16.msra.mxu3 %v3723_v26  ;;  %v4518_v26 = vld [vmem:[#allocation4 + $0x3ec] sm:$0xf0]  ;;  %v3743_v47 = vor.u32 %v4407_v33, %v3742_v30  ;;  %v3979_v17 = vor.u32 %v4464_v13, %v3976_v14 }
 0x10d   :  { %v4183_v50 = vor.u32 %v4518_v26, %v4182_v25  ;;  %v3695_v25 = vor.u32 %v4395_v12, %v3694_v11  ;;  %v4460_v26 = vld [vmem:[#allocation4 + $0x224] sm:$0xf]  ;;  %v4498_v30 = vld [vmem:[#allocation4 + $0x34c] sm:$0xf0]  ;;  %v3822_v11 = vld [vmem:[#allocation4 + $0x108] sm:$0xf] }
 0x10e   :  { %v1478_v8 = vpop.f32.mrf.mxu3  ;;  %v4782_v7 = vpop.f32.mrf.mxu0  ;;  %v3963_v33 = vor.u32 %v4460_v26, %v3960_v27  ;;  %v4405_v12 = vld [vmem:[#allocation4 + $0x6c] sm:$0xf] }
 0x10f   :  { %2543 = vmatpush.bf16.msra.mxu1 %v3835_v54  ;;  %2552 = vmatpush.bf16.msra.mxu2 %v4043_v24  ;;  %v1479_v39 = vadd.f32 %v1478_v8, %v1465_v28  ;;  %v1678_v54 = vmax.f32 %v1477_v21, 0.0  ;;  %v1490_v20 = vpop.f32.mrf.mxu1  ;;  %v3811_v28 = vor.u32 %v4421_v23, %v3808_v55  ;;  %v3870_v21 = vld [vmem:[#allocation4 + $0x168] sm:$0xf]  ;;  %v3792_v8 = vld [vmem:[#allocation4 + $0xd8] sm:$0xf0] }
 0x110   :  { %2529 = vmatpush.bf16.msra.mxu3 %v3707_v38  ;;  %2509 = vmatpush.bf16.msrb.mxu0 %v4183_v50  ;;  %v4514_v38 = vld [vmem:[#allocation4 + $0x3cc] sm:$0xf0]  ;;  %v3887_v50 = vor.u32 %v4443_v22, %v3886_v16  ;;  %v3871_v41 = vor.u32 %v4439_v31, %v3870_v21  ;;  %v1491_v63 = vadd.f32 %v1490_v20, %v295_v53  ;;  %v4512_v16 = vld [vmem:[#allocation4 + $0x3c4] sm:$0xf]  ;;  %v4453_v22 = vld [vmem:[#allocation4 + $0x1ec] sm:$0xf] }
 0x111   :  { %v4167_v43 = vor.u32 %v4514_v38, %v4166_v36  ;;  %v1682_v46 = vmax.f32 %v1479_v39, 0.0  ;;  %v4456_v38 = vld [vmem:[#allocation4 + $0x204] sm:$0xf]  ;;  %v3944_v39 = vld [vmem:[#allocation4 + $0x210] sm:$0xf0] }
 0x112   :  { %v3936_v20 = vld [vmem:[#allocation4 + $0x1f8] sm:$0xf0]  ;;  %v4401_v26 = vld [vmem:[#allocation4 + $0x4c] sm:$0xf]  ;;  %v4152_v21 = vld [vmem:[#allocation4 + $0x3b0] sm:$0xf0] }
 0x113   :  { %2544 = vmatpush.bf16.msra.mxu1 %v3819_v42  ;;  %2553 = vmatpush.bf16.msra.mxu2 %v4027_v34  ;;  %v4779_v35 = vpack.c.bf16 %v1682_v46, %v1678_v54  ;;  %v3710_v42 = vld [vmem:[#allocation4 + $0x28] sm:$0xf]  ;;  %v4086_v54 = vld [vmem:[#allocation4 + $0x320] sm:$0xf]  ;;  %v4494_v46 = vld [vmem:[#allocation4 + $0x32c] sm:$0xf0]  ;;  %v3939_v27 = vor.u32 %v4453_v22, %v3936_v20 }
 0x114   :  { %2530 = vmatpush.bf16.msra.mxu3 %v3691_v60  ;;  %2510 = vmatpush.bf16.msrb.mxu0 %v4167_v43  ;;  %v3918_v60 = vld [vmem:[#allocation4 + $0x1c8] sm:$0xf]  ;;  %v3711_v10 = vor.u32 %v4399_v1, %v3710_v42  ;;  %v3795_v43 = vor.u32 %v4417_v32, %v3792_v8  ;;  %v4087_v52 = vor.u32 %v4494_v46, %v4086_v54  ;;  %v4070_v42 = vld [vmem:[#allocation4 + $0x300] sm:$0xf]  ;;  %v4516_v1 = vld [vmem:[#allocation4 + $0x3e4] sm:$0xf] }
 0x115   :  { %2489 = vmatmul.bf16.vlgmr.msrb.gmra.mxu1 %v4779_v35  ;;  %v3919_v0 = vor.u32 %v4451_v57, %v3918_v60  ;;  %v3838_v60 = vld [vmem:[#allocation4 + $0x128] sm:$0xf]  ;;  %v4431_v57 = vld [vmem:[#allocation4 + $0x134] sm:$0xf0]  ;;  %v4449_v31 = vld [vmem:[#allocation4 + $0x1cc] sm:$0xf] }
 0x116   :  { %v4784_v40 = vpop.f32.mrf.mxu0  ;;  %v3920_v32 = vld [vmem:[#allocation4 + $0x1d8] sm:$0xf0]  ;;  %v4492_v22 = vld [vmem:[#allocation4 + $0x324] sm:$0xf]  ;;  %v4088_v20 = vld [vmem:[#allocation4 + $0x330] sm:$0xf0] }
 0x117   :  { %2531 = vmatmul.bf16.vlgmr.msra.gmra.mxu3 %v4770_v45  ;;  %2593 = vmatpush.bf16.msrb.mxu1 %v3935_v51  ;;  %v3947_v51 = vor.u32 %v4456_v38, %v3944_v39  ;;  %v1492_v56 = vpop.f32.mrf.mxu1  ;;  %v3923_v38 = vor.u32 %v4449_v31, %v3920_v32  ;;  %v3712_v39 = vld [vmem:[#allocation4 + $0x38] sm:$0xf0]  ;;  %v296_v31 = vperm.slane %v4755_v9, 3  ;;  %v4429_v32 = vld [vmem:[#allocation4 + $0x12c] sm:$0xf] }
 0x118   :  { %2579 = vmatpush.bf16.msrb.mxu3 %v3807_v59  ;;  %v3727_v59 = vor.u32 %v4403_v48, %v3726_v44  ;;  %2554 = vmatpush.bf16.msra.mxu2 %v4011_v37  ;;  %v3854_v44 = vld [vmem:[#allocation4 + $0x148] sm:$0xf]  ;;  %v4413_v48 = vld [vmem:[#allocation4 + $0xac] sm:$0xf] }
 0x119   :  { %2511 = vmatpush.bf16.msrb.mxu0 %v4151_v58  ;;  %v3779_v58 = vor.u32 %v4413_v48, %v3776_v49 }
 0x11a   :  { %v1504_v36 = vpop.f32.mrf.mxu3 }
 0x11b   :  { %2594 = vmatpush.bf16.msrb.mxu1 %v3919_v0  ;;  %v4071_v0 = vor.u32 %v4490_v62, %v4070_v42  ;;  %v1532_v13 = vpop.f32.mrf.mxu2  ;;  %v4441_v42 = vld [vmem:[#allocation4 + $0x18c] sm:$0xf]  ;;  %v3888_v62 = vld [vmem:[#allocation4 + $0x198] sm:$0xf0] }
 0x11c   :  { %2580 = vmatpush.bf16.msrb.mxu3 %v3791_v5  ;;  %v4447_v5 = vld [vmem:[#allocation4 + $0x1b4] sm:$0xf0]  ;;  %2555 = vmatpush.bf16.msra.mxu2 %v3995_v2  ;;  %v4184_v2 = vld [vmem:[#allocation4 + $0x3f0] sm:$0xf0] }
 0x11d   :  { %v3903_v15 = vor.u32 %v4447_v5, %v3902_v4  ;;  %2512 = vmatpush.bf16.msrb.mxu0 %v4135_v6  ;;  %v4187_v3 = vor.u32 %v4516_v1, %v4184_v2  ;;  %v3839_v5 = vor.u32 %v4431_v57, %v3838_v60  ;;  %v3696_v57 = vld [vmem:[#allocation4 + $0x18] sm:$0xf0] }
 0x11e   :  { %v4789_v4 = vpop.f32.mrf.mxu0 }
 0x11f   :  { %2595 = vmatpush.bf16.msrb.mxu1 %v3903_v15  ;;  %v3744_v15 = vld [vmem:[#allocation4 + $0x78] sm:$0xf0] }
 0x120   :  { %2581 = vmatpush.bf16.msrb.mxu3 %v3775_v18  ;;  %v4118_v18 = vld [vmem:[#allocation4 + $0x360] sm:$0xf]  ;;  %2556 = vmatpush.bf16.msra.mxu2 %v3979_v17  ;;  %v4168_v17 = vld [vmem:[#allocation4 + $0x3d0] sm:$0xf0] }
 0x121   :  { %v4119_v24 = vor.u32 %v4502_v19, %v4118_v18  ;;  %v1505_v18 = vadd.f32 %v1504_v36, %v1491_v63  ;;  %v1493_v19 = vadd.f32 %v1492_v56, %v295_v53  ;;  %v4171_v23 = vor.u32 %v4512_v16, %v4168_v17  ;;  %v4393_v53 = vld [vmem:[#allocation4 + $0xc] sm:$0xf]  ;;  %v4062_v16 = vld [vmem:[#allocation4 + $0x2e8] sm:$0xf]  ;;  %v4487_v17 = vld [vmem:[#allocation4 + $0x2f4] sm:$0xf0] }
 0x122   :  { %v1506_v14 = vpop.f32.mrf.mxu3  ;;  %v3699_v1 = vor.u32 %v4393_v53, %v3696_v57  ;;  %v3891_v63 = vor.u32 %v4441_v42, %v3888_v62  ;;  %v4471_v53 = vld [vmem:[#allocation4 + $0x274] sm:$0xf0]  ;;  %v3982_v62 = vld [vmem:[#allocation4 + $0x248] sm:$0xf] }
 0x123   :  { %2513 = vmatpush.bf16.msrb.mxu0 %v4119_v24  ;;  %2596 = vmatpush.bf16.msrb.mxu1 %v3887_v50  ;;  %v3728_v50 = vld [vmem:[#allocation4 + $0x58] sm:$0xf0]  ;;  %v1534_v49 = vpop.f32.mrf.mxu2 }
 0x124   :  { %2582 = vmatpush.bf16.msrb.mxu3 %v3759_v29  ;;  %v4102_v29 = vld [vmem:[#allocation4 + $0x340] sm:$0xf]  ;;  %2557 = vmatpush.bf16.msra.mxu2 %v3963_v33  ;;  %v3731_v33 = vor.u32 %v4401_v26, %v3728_v50  ;;  %v4063_v26 = vor.u32 %v4487_v17, %v4062_v16  ;;  %v4046_v50 = vld [vmem:[#allocation4 + $0x2c8] sm:$0xf]  ;;  %v4485_v17 = vld [vmem:[#allocation4 + $0x2ec] sm:$0xf] }
 0x125   :  { %v4103_v34 = vor.u32 %v4498_v30, %v4102_v29  ;;  %2545 = vmatmul.bf16.vlgmr.msra.gmra.mxu1 %v4779_v35  ;;  %v1519_v29 = vadd.f32 %v4782_v7, %v1505_v18  ;;  %v1507_v30 = vadd.f32 %v1506_v14, %v1493_v19  ;;  %v4445_v7 = vld [vmem:[#allocation4 + $0x1ac] sm:$0xf] }
 0x126   :  { %v1576_v46 = vpop.f32.mrf.mxu0 }
 0x127   :  { %2514 = vmatpush.bf16.msrb.mxu0 %v4103_v34  ;;  %2597 = vmatpush.bf16.msrb.mxu1 %v3871_v41  ;;  %v4397_v34 = vld [vmem:[#allocation4 + $0x2c] sm:$0xf]  ;;  %v4504_v41 = vld [vmem:[#allocation4 + $0x384] sm:$0xf]  ;;  %v1521_v54 = vadd.f32 %v4784_v40, %v1507_v30  ;;  %v4072_v30 = vld [vmem:[#allocation4 + $0x310] sm:$0xf0] }
 0x128   :  { %2583 = vmatpush.bf16.msrb.mxu3 %v3743_v47  ;;  %v4435_v47 = vld [vmem:[#allocation4 + $0x154] sm:$0xf0]  ;;  %2558 = vmatpush.bf16.msra.mxu2 %v3947_v51 }
 0x129   :  { %v3855_v37 = vor.u32 %v4435_v47, %v3854_v44  ;;  %v1533_v44 = vadd.f32 %v1532_v13, %v1519_v29  ;;  %v3904_v47 = vld [vmem:[#allocation4 + $0x1b8] sm:$0xf0]  ;;  %v4488_v29 = vld [vmem:[#allocation4 + $0x304] sm:$0xf] }
 0x12a   :  { %v3907_v60 = vor.u32 %v4445_v7, %v3904_v47  ;;  %v4014_v7 = vld [vmem:[#allocation4 + $0x288] sm:$0xf]  ;;  %v4475_v47 = vld [vmem:[#allocation4 + $0x294] sm:$0xf0] }
 0x12b   :  { %2515 = vmatpush.bf16.msrb.mxu0 %v4087_v52  ;;  %2598 = vmatpush.bf16.msrb.mxu1 %v3855_v37  ;;  %v3715_v52 = vor.u32 %v4397_v34, %v3712_v39  ;;  %v4500_v37 = vld [vmem:[#allocation4 + $0x364] sm:$0xf] }
 0x12c   :  { %2584 = vmatpush.bf16.msrb.mxu3 %v3727_v59  ;;  %v4409_v59 = vld [vmem:[#allocation4 + $0x8c] sm:$0xf] }
 0x12d   :  { %v3763_v6 = vor.u32 %v4409_v59, %v3760_v61  ;;  %v1535_v59 = vadd.f32 %v1534_v49, %v1521_v54  ;;  %v3824_v54 = vld [vmem:[#allocation4 + $0x118] sm:$0xf0] }
 0x12f   :  { %2516 = vmatpush.bf16.msrb.mxu0 %v4071_v0  ;;  %v1546_v55 = vpop.f32.mrf.mxu1  ;;  %2599 = vmatpush.bf16.msrb.mxu1 %v3839_v5  ;;  %v4104_v5 = vld [vmem:[#allocation4 + $0x350] sm:$0xf0] }
 0x130   :  { %2585 = vmatpush.bf16.msrb.mxu3 %v3711_v10  ;;  %v4427_v10 = vld [vmem:[#allocation4 + $0x114] sm:$0xf0]  ;;  %v1547_v51 = vadd.f32 %v1546_v55, %v1533_v44  ;;  %v4425_v44 = vld [vmem:[#allocation4 + $0x10c] sm:$0xf] }
 0x131   :  { %v3823_v24 = vor.u32 %v4427_v10, %v3822_v11  ;;  %v4437_v10 = vld [vmem:[#allocation4 + $0x16c] sm:$0xf] }
 0x133   :  { %2565 = vmatpush.bf16.msra.mxu0 %v4187_v3  ;;  %2600 = vmatpush.bf16.msrb.mxu1 %v3823_v24  ;;  %v4496_v3 = vld [vmem:[#allocation4 + $0x344] sm:$0xf]  ;;  %v4433_v24 = vld [vmem:[#allocation4 + $0x14c] sm:$0xf] }
 0x134   :  { %2586 = vmatpush.bf16.msrb.mxu3 %v3695_v25  ;;  %v3747_v25 = vor.u32 %v4405_v12, %v3744_v15  ;;  %v3872_v12 = vld [vmem:[#allocation4 + $0x178] sm:$0xf0]  ;;  %v4107_v13 = vor.u32 %v4496_v3, %v4104_v5  ;;  %v1602_v15 = vpop.f32.mrf.mxu0  ;;  %v4463_v3 = vld [vmem:[#allocation4 + $0x234] sm:$0xf0] }
 0x135   :  { %v3875_v19 = vor.u32 %v4437_v10, %v3872_v12 }
 0x136   :  { %2601 = vmatmul.bf16.vlgmr.msrb.gmra.mxu1 %v4779_v35 }
 0x137   :  { %2587 = vmatmul.bf16.vlgmr.msrb.gmra.mxu3 %v4770_v45  ;;  %2566 = vmatpush.bf16.msra.mxu0 %v4171_v23  ;;  %v1548_v56 = vpop.f32.mrf.mxu1 }
 0x138   :  { %2635 = vmatpush.bf16.msra.mxu3 %v3811_v28  ;;  %v4508_v28 = vld [vmem:[#allocation4 + $0x3a4] sm:$0xf]  ;;  %2649 = vmatpush.bf16.msra.mxu1 %v3939_v27  ;;  %v1549_v0 = vadd.f32 %v1548_v56, %v1535_v59 }
 0x139   :  { %v4155_v8 = vor.u32 %v4508_v28, %v4152_v21  ;;  %v4483_v28 = vld [vmem:[#allocation4 + $0x2d4] sm:$0xf0] }
 0x13a   :  { %v1560_v36 = vpop.f32.mrf.mxu3  ;;  %v4047_v34 = vor.u32 %v4483_v28, %v4046_v50  ;;  %v4190_v50 = vld [vmem:[#allocation4 + $0x3e8] sm:$0xf]  ;;  %v4519_v28 = vld [vmem:[#allocation4 + $0x3f4] sm:$0xf0] }
 0x13b   :  { %2567 = vmatpush.bf16.msra.mxu0 %v4155_v8  ;;  %v1561_v40 = vadd.f32 %v1560_v36, %v1547_v51  ;;  %v1588_v18 = vpop.f32.mrf.mxu2  ;;  %v3840_v8 = vld [vmem:[#allocation4 + $0x138] sm:$0xf0]  ;;  %v4479_v36 = vld [vmem:[#allocation4 + $0x2b4] sm:$0xf0]  ;;  %v4015_v51 = vor.u32 %v4475_v47, %v4014_v7  ;;  %v4142_v47 = vld [vmem:[#allocation4 + $0x388] sm:$0xf] }
 0x13c   :  { %2636 = vmatpush.bf16.msra.mxu3 %v3795_v43  ;;  %v4136_v43 = vld [vmem:[#allocation4 + $0x390] sm:$0xf0]  ;;  %2650 = vmatpush.bf16.msra.mxu1 %v3923_v38  ;;  %v3843_v39 = vor.u32 %v4429_v32, %v3840_v8  ;;  %v4477_v32 = vld [vmem:[#allocation4 + $0x2ac] sm:$0xf]  ;;  %v4032_v8 = vld [vmem:[#allocation4 + $0x2b8] sm:$0xf0] }
 0x13d   :  { %v4139_v48 = vor.u32 %v4504_v41, %v4136_v43  ;;  %v1589_v41 = vadd.f32 %v1588_v18, %v296_v31  ;;  %v1604_v43 = vpop.f32.mrf.mxu0  ;;  %v4064_v18 = vld [vmem:[#allocation4 + $0x2f8] sm:$0xf0] }
 0x13e   :  { %v4000_v7 = vld [vmem:[#allocation4 + $0x278] sm:$0xf0] }
 0x13f   :  { %2568 = vmatpush.bf16.msra.mxu0 %v4139_v48  ;;  %v3827_v48 = vor.u32 %v4425_v44, %v3824_v54  ;;  %v1603_v49 = vadd.f32 %v1602_v15, %v1589_v41  ;;  %v3950_v15 = vld [vmem:[#allocation4 + $0x208] sm:$0xf]  ;;  %v4016_v41 = vld [vmem:[#allocation4 + $0x298] sm:$0xf0]  ;;  %v4511_v44 = vld [vmem:[#allocation4 + $0x3b4] sm:$0xf0] }
 0x140   :  { %2637 = vmatpush.bf16.msra.mxu3 %v3779_v58  ;;  %v4120_v58 = vld [vmem:[#allocation4 + $0x370] sm:$0xf0]  ;;  %2651 = vmatpush.bf16.msra.mxu1 %v3907_v60 }
 0x141   :  { %v4123_v61 = vor.u32 %v4500_v37, %v4120_v58 }
 0x142   :  { %v1562_v2 = vpop.f32.mrf.mxu3 }
 0x143   :  { %v1563_v11 = vadd.f32 %v1562_v2, %v1549_v0  ;;  %2569 = vmatpush.bf16.msra.mxu0 %v4123_v61  ;;  %v4467_v61 = vld [vmem:[#allocation4 + $0x254] sm:$0xf0] }
 0x144   :  { %2638 = vmatpush.bf16.msra.mxu3 %v3763_v6  ;;  %v1575_v6 = vadd.f32 %v4789_v4, %v1561_v40  ;;  %2652 = vmatpush.bf16.msra.mxu1 %v3891_v63  ;;  %v4091_v4 = vor.u32 %v4492_v22, %v4088_v20  ;;  %v3966_v63 = vld [vmem:[#allocation4 + $0x228] sm:$0xf] }
 0x145   :  { %v1577_v14 = vadd.f32 %v1576_v46, %v1563_v11  ;;  %v1590_v46 = vpop.f32.mrf.mxu2  ;;  %v3967_v12 = vor.u32 %v4463_v3, %v3966_v63  ;;  %v4495_v63 = vld [vmem:[#allocation4 + $0x334] sm:$0xf0] }
 0x146   :  { %v1679_v23 = vmax.f32 %v1575_v6, 0.0  ;;  %v1591_v37 = vadd.f32 %v1590_v46, %v296_v31  ;;  %v4191_v31 = vor.u32 %v4519_v28, %v4190_v50  ;;  %v4493_v50 = vld [vmem:[#allocation4 + $0x32c] sm:$0xf]  ;;  %v4096_v28 = vld [vmem:[#allocation4 + $0x338] sm:$0xf0] }
 0x147   :  { %v1683_v55 = vmax.f32 %v1577_v14, 0.0  ;;  %2570 = vmatpush.bf16.msra.mxu0 %v4107_v13 }
 0x148   :  { %2639 = vmatpush.bf16.msra.mxu3 %v3747_v25  ;;  %v3856_v25 = vld [vmem:[#allocation4 + $0x158] sm:$0xf0]  ;;  %2653 = vmatpush.bf16.msra.mxu1 %v3875_v19  ;;  %v1605_v0 = vadd.f32 %v1604_v43, %v1591_v37  ;;  %v4158_v43 = vld [vmem:[#allocation4 + $0x3a8] sm:$0xf] }
 0x149   :  { %v4796_v27 = vpack.c.bf16 %v1683_v55, %v1679_v23  ;;  %v3859_v21 = vor.u32 %v4433_v24, %v3856_v25  ;;  %v4067_v55 = vor.u32 %v4485_v17, %v4064_v18  ;;  %v4481_v25 = vld [vmem:[#allocation4 + $0x2cc] sm:$0xf]  ;;  %v4159_v46 = vor.u32 %v4511_v44, %v4158_v43  ;;  %v4160_v18 = vld [vmem:[#allocation4 + $0x3b8] sm:$0xf0] }
 0x14a   :  { %v4509_v17 = vld [vmem:[#allocation4 + $0x3ac] sm:$0xf]  ;;  %v2706_v43 = vld [vmem:[#allocation6 + $0x38] sm:$0xff] }
 0x14b   :  { %2503 = vmatmul.bf16.vlgmr.msrb.gmra.mxu2 %v4796_v27  ;;  %2571 = vmatpush.bf16.msra.mxu0 %v4091_v4  ;;  %v4048_v4 = vld [vmem:[#allocation4 + $0x2d8] sm:$0xf0] }
 0x14c   :  { %2640 = vmatpush.bf16.msra.mxu3 %v3731_v33  ;;  %v4075_v33 = vor.u32 %v4488_v29, %v4072_v30  ;;  %2607 = vmatpush.bf16.msrb.mxu2 %v4063_v26  ;;  %v4051_v30 = vor.u32 %v4481_v25, %v4048_v4  ;;  %v4112_v4 = vld [vmem:[#allocation4 + $0x358] sm:$0xf0] }
 0x14d   :  { %2654 = vmatpush.bf16.msra.mxu1 %v3859_v21  ;;  %v2730_v44 = vld [vmem:[#allocation6 + $0xf8] sm:$0xff] }
 0x14f   :  { %v1616_v38 = vpop.f32.mrf.mxu1  ;;  %2572 = vmatpush.bf16.msra.mxu0 %v4075_v33 }
 0x150   :  { %2641 = vmatpush.bf16.msra.mxu3 %v3715_v52  ;;  %2608 = vmatpush.bf16.msrb.mxu2 %v4047_v34  ;;  %v3998_v52 = vld [vmem:[#allocation4 + $0x268] sm:$0xf]  ;;  %v1617_v60 = vadd.f32 %v1616_v38, %v1603_v49 }
 0x151   :  { %2655 = vmatpush.bf16.msra.mxu1 %v3843_v39  ;;  %v3999_v59 = vor.u32 %v4471_v53, %v3998_v52  ;;  %v4174_v34 = vld [vmem:[#allocation4 + $0x3c8] sm:$0xf]  ;;  %v4473_v39 = vld [vmem:[#allocation4 + $0x28c] sm:$0xf]  ;;  %v3984_v53 = vld [vmem:[#allocation4 + $0x258] sm:$0xf0] }
 0x152   :  { %v1658_v40 = vpop.f32.mrf.mxu0  ;;  %v4019_v54 = vor.u32 %v4473_v39, %v4016_v41  ;;  %v4465_v52 = vld [vmem:[#allocation4 + $0x24c] sm:$0xf]  ;;  %v2707_v41 = vld [vmem:[#allocation6 + $0x40] sm:$0xff] }
 0x153   :  { %v2708_v39 = vld [vmem:[#allocation6 + $0x48] sm:$0xff] }
 0x154   :  { %2642 = vmatpush.bf16.msra.mxu3 %v3699_v1  ;;  %v3983_v1 = vor.u32 %v4467_v61, %v3982_v62 }
 0x155   :  { %2656 = vmatpush.bf16.msra.mxu1 %v3827_v48  ;;  %v4507_v48 = vld [vmem:[#allocation4 + $0x394] sm:$0xf0] }
 0x157   :  { %2643 = vmatmul.bf16.vlgmr.msra.gmra.mxu3 %v4770_v45  ;;  %v4030_v45 = vld [vmem:[#allocation4 + $0x2a8] sm:$0xf]  ;;  %v1618_v56 = vpop.f32.mrf.mxu1 }
 0x158   :  { %v4031_v9 = vor.u32 %v4479_v36, %v4030_v45  ;;  %2657 = vmatmul.bf16.vlgmr.msra.gmra.mxu1 %v4779_v35  ;;  %v1619_v5 = vadd.f32 %v1618_v56, %v1605_v0  ;;  %v4459_v35 = vld [vmem:[#allocation4 + $0x214] sm:$0xf0]  ;;  %v4035_v36 = vor.u32 %v4477_v32, %v4032_v8  ;;  %v4126_v56 = vld [vmem:[#allocation4 + $0x368] sm:$0xf]  ;;  %v4457_v0 = vld [vmem:[#allocation4 + $0x20c] sm:$0xf] }
 0x159   :  { %v3951_v20 = vor.u32 %v4459_v35, %v3950_v15  ;;  %v4515_v45 = vld [vmem:[#allocation4 + $0x3d4] sm:$0xf0]  ;;  %v4513_v15 = vld [vmem:[#allocation4 + $0x3cc] sm:$0xf]  ;;  %v4176_v35 = vld [vmem:[#allocation4 + $0x3d8] sm:$0xf0]  ;;  %2790 = vmatpush.msrb.mxu1 %v2730_v44 }
 0x15a   :  { %2609 = vmatpush.bf16.msrb.mxu2 %v4031_v9  ;;  %v1630_v57 = vpop.f32.mrf.mxu3  ;;  %v1660_v19 = vpop.f32.mrf.mxu0  ;;  %v4175_v38 = vor.u32 %v4515_v45, %v4174_v34  ;;  %v4469_v9 = vld [vmem:[#allocation4 + $0x26c] sm:$0xf]  ;;  %v2714_v32 = vld [vmem:[#allocation6 + $0x78] sm:$0xff]  ;;  %v2713_v8 = vld [vmem:[#allocation6 + $0x70] sm:$0xff] }
 0x15b   :  { %v1644_v58 = vpop.f32.mrf.mxu2  ;;  %v1631_v42 = vadd.f32 %v1630_v57, %v1617_v60  ;;  %2559 = vmatmul.bf16.vlgmr.msra.gmra.mxu2 %v4796_v27  ;;  %v4003_v49 = vor.u32 %v4469_v9, %v4000_v7  ;;  %v4503_v60 = vld [vmem:[#allocation4 + $0x374] sm:$0xf0]  ;;  %v3987_v57 = vor.u32 %v4465_v52, %v3984_v53  ;;  %2767 = vmatpush.msrb.mxu3 %v2714_v32  ;;  %v2712_v34 = vld [vmem:[#allocation6 + $0x68] sm:$0xff]  ;;  %v2711_v45 = vld [vmem:[#allocation6 + $0x60] sm:$0xff] }
 0x15c   :  { %v4127_v37 = vor.u32 %v4503_v60, %v4126_v56  ;;  %v2704_v9 = vld [vmem:[#allocation6 + $0x28] sm:$0xff]  ;;  %v2703_v7 = vld [vmem:[#allocation6 + $0x20] sm:$0xff]  ;;  %v2725_v52 = vld [vmem:[#allocation6 + $0xd0] sm:$0xff] }
 0x15d   :  { %v1645_v2 = vadd.f32 %v1644_v58, %v1631_v42  ;;  %v4461_v58 = vld [vmem:[#allocation4 + $0x22c] sm:$0xf]  ;;  %v4499_v42 = vld [vmem:[#allocation4 + $0x354] sm:$0xf0]  ;;  %2768 = vmatpush.msrb.mxu3 %v2713_v8  ;;  %v2699_v60 = vld [vmem:[#allocation6] sm:$0xff] }
 0x15e   :  { %2610 = vmatpush.bf16.msrb.mxu2 %v4015_v51  ;;  %v4143_v51 = vor.u32 %v4507_v48, %v4142_v47  ;;  %v2727_v47 = vld [vmem:[#allocation6 + $0xe0] sm:$0xff]  ;;  %v2702_v48 = vld [vmem:[#allocation6 + $0x18] sm:$0xff]  ;;  %v2700_v53 = vld [vmem:[#allocation6 + $0x8] sm:$0xff] }
 0x15f   :  { %v1672_v6 = vpop.f32.mrf.mxu1  ;;  %v1659_v13 = vadd.f32 %v1658_v40, %v1645_v2  ;;  %v4110_v40 = vld [vmem:[#allocation4 + $0x348] sm:$0xf]  ;;  %2769 = vmatpush.msrb.mxu3 %v2712_v34  ;;  %v2761_v32 = vld [vmem:[#allocation6 + $0x1f0] sm:$0xff]  ;;  %v2759_v44 = vld [vmem:[#allocation6 + $0x1e0] sm:$0xff] }
 0x160   :  { %v4111_v61 = vor.u32 %v4499_v42, %v4110_v40  ;;  %v4094_v2 = vld [vmem:[#allocation4 + $0x328] sm:$0xf]  ;;  %v2745_v40 = vld [vmem:[#allocation6 + $0x170] sm:$0xff] }
 0x161   :  { %v1673_v23 = vadd.f32 %v1672_v6, %v1659_v13  ;;  %v4078_v6 = vld [vmem:[#allocation4 + $0x308] sm:$0xf]  ;;  %2770 = vmatpush.msrb.mxu3 %v2711_v45 }
 0x162   :  { %2611 = vmatpush.bf16.msrb.mxu2 %v3999_v59  ;;  %v1632_v11 = vpop.f32.mrf.mxu3  ;;  %v3968_v59 = vld [vmem:[#allocation4 + $0x238] sm:$0xf0]  ;;  %v2724_v56 = vld [vmem:[#allocation6 + $0xc8] sm:$0xff] }
 0x163   :  { %v1633_v10 = vadd.f32 %v1632_v11, %v1619_v5  ;;  %v1646_v14 = vpop.f32.mrf.mxu2  ;;  %v1680_v21 = vmax.f32 %v1673_v23, 0.0  ;;  %v3971_v62 = vor.u32 %v4461_v58, %v3968_v59  ;;  %v4095_v5 = vor.u32 %v4495_v63, %v4094_v2  ;;  %v4491_v11 = vld [vmem:[#allocation4 + $0x314] sm:$0xf0]  ;;  %v2721_v59 = vld [vmem:[#allocation6 + $0xb0] sm:$0xff]  ;;  %v2720_v42 = vld [vmem:[#allocation6 + $0xa8] sm:$0xff] }
 0x164   :  { %v4079_v13 = vor.u32 %v4491_v11, %v4078_v6  ;;  %v2746_v58 = vld [vmem:[#allocation6 + $0x178] sm:$0xff] }
 0x165   :  { %v1647_v16 = vadd.f32 %v1646_v14, %v1633_v10  ;;  %v4517_v10 = vld [vmem:[#allocation4 + $0x3ec] sm:$0xf]  ;;  %v2742_v2 = vld [vmem:[#allocation6 + $0x158] sm:$0xff] }
 0x166   :  { %2612 = vmatpush.bf16.msrb.mxu2 %v3983_v1  ;;  %v3952_v1 = vld [vmem:[#allocation4 + $0x218] sm:$0xf0] }
 0x167   :  { %v1661_v22 = vadd.f32 %v1660_v19, %v1647_v16  ;;  %v1674_v24 = vpop.f32.mrf.mxu1  ;;  %v3955_v3 = vor.u32 %v4457_v0, %v3952_v1  ;;  %v4179_v16 = vor.u32 %v4513_v15, %v4176_v35  ;;  %v4163_v19 = vor.u32 %v4509_v17, %v4160_v18  ;;  %v2743_v0 = vld [vmem:[#allocation6 + $0x160] sm:$0xff]  ;;  %v2718_v1 = vld [vmem:[#allocation6 + $0x98] sm:$0xff]  ;;  %v2737_v17 = vld [vmem:[#allocation6 + $0x130] sm:$0xff] }
 0x168   :  { %v4813_v15 = vld [vmem:[%s4838_s4] sm:$0xf]  ;;  %v2738_v35 = vld [vmem:[#allocation6 + $0x138] sm:$0xff] }
 0x169   :  { %v1675_v26 = vadd.f32 %v1674_v24, %v1661_v22  ;;  %v4505_v22 = vld [vmem:[#allocation4 + $0x38c] sm:$0xf]  ;;  %v4128_v24 = vld [vmem:[#allocation4 + $0x378] sm:$0xf0] }
 0x16a   :  { %2613 = vmatpush.bf16.msrb.mxu2 %v3967_v12  ;;  %v4192_v12 = vld [vmem:[#allocation4 + $0x3f8] sm:$0xf0] }
 0x16b   :  { %v1684_v29 = vmax.f32 %v1675_v26, 0.0  ;;  %v4195_v14 = vor.u32 %v4517_v10, %v4192_v12  ;;  %v2716_v10 = vld [vmem:[#allocation6 + $0x88] sm:$0xff] }
 0x16c   :  { %v2740_v12 = vld [vmem:[#allocation6 + $0x148] sm:$0xff] }
 0x16d   :  { %v4802_v33 = vpack.c.bf16 %v1684_v29, %v1680_v21  ;;  %v4099_v21 = vor.u32 %v4493_v50, %v4096_v28  ;;  %v4489_v29 = vld [vmem:[#allocation4 + $0x30c] sm:$0xf] }
 0x16e   :  { %2614 = vmatpush.bf16.msrb.mxu2 %v3951_v20  ;;  %v4144_v20 = vld [vmem:[#allocation4 + $0x398] sm:$0xf0]  ;;  %v2732_v28 = vld [vmem:[#allocation6 + $0x108] sm:$0xff] }
 0x16f   :  { %2517 = vmatmul.bf16.vlgmr.msrb.gmra.mxu0 %v4802_v33  ;;  %v4147_v23 = vor.u32 %v4505_v22, %v4144_v20  ;;  %v2735_v20 = vld [vmem:[#allocation6 + $0x120] sm:$0xff] }
 0x170   :  { %2621 = vmatpush.bf16.msrb.mxu0 %v4191_v31 }
 0x171   :  { %2615 = vmatmul.bf16.vlgmr.msrb.gmra.mxu2 %v4796_v27 }
 0x172   :  { %2663 = vmatpush.bf16.msra.mxu2 %v4067_v55  ;;  %v4501_v55 = vld [vmem:[#allocation4 + $0x36c] sm:$0xf] }
 0x173   :  { %v4131_v25 = vor.u32 %v4501_v55, %v4128_v24 }
 0x174   :  { %2622 = vmatpush.bf16.msrb.mxu0 %v4175_v38  ;;  %v2709_v38 = vld [vmem:[#allocation6 + $0x50] sm:$0xff] }
 0x176   :  { %2664 = vmatpush.bf16.msra.mxu2 %v4051_v30  ;;  %v4080_v30 = vld [vmem:[#allocation4 + $0x318] sm:$0xf0] }
 0x177   :  { %v4083_v31 = vor.u32 %v4489_v29, %v4080_v30 }
 0x178   :  { %2623 = vmatpush.bf16.msrb.mxu0 %v4159_v46  ;;  %v2728_v46 = vld [vmem:[#allocation6 + $0xe8] sm:$0xff] }
 0x17a   :  { %2665 = vmatpush.bf16.msra.mxu2 %v4035_v36  ;;  %v2710_v36 = vld [vmem:[#allocation6 + $0x58] sm:$0xff]  ;;  %v2476_v6 = vpop.f32.mrf.mxu3 }
 0x17b   :  { %2771 = vmatpush.msrb.mxu3 %v2710_v36  ;;  %v2760_v36 = vld [vmem:[#allocation6 + $0x1e8] sm:$0xff] }
 0x17c   :  { %2624 = vmatpush.bf16.msrb.mxu0 %v4143_v51  ;;  %v2701_v51 = vld [vmem:[#allocation6 + $0x10] sm:$0xff] }
 0x17d   :  { %2772 = vmatpush.msrb.mxu3 %v2709_v38 }
 0x17e   :  { %2666 = vmatpush.bf16.msra.mxu2 %v4019_v54  ;;  %v2729_v54 = vld [vmem:[#allocation6 + $0xf0] sm:$0xff] }
 0x17f   :  { %2573 = vmatmul.bf16.vlgmr.msra.gmra.mxu0 %v4802_v33  ;;  %2773 = vmatpush.msrb.mxu3 %v2708_v39  ;;  %v1820_v39 = vperm.slane %v4813_v15, 1 }
 0x180   :  { %2625 = vmatpush.bf16.msrb.mxu0 %v4127_v37  ;;  %2791 = vmatpush.msrb.mxu1 %v2729_v54  ;;  %v2722_v37 = vld [vmem:[#allocation6 + $0xb8] sm:$0xff] }
 0x181   :  { %2774 = vmatpush.msrb.mxu3 %v2707_v41  ;;  %v2758_v54 = vld [vmem:[#allocation6 + $0x1d8] sm:$0xff] }
 0x182   :  { %2667 = vmatpush.bf16.msra.mxu2 %v4003_v49  ;;  %2792 = vmatpush.msrb.mxu1 %v2728_v46  ;;  %v2726_v49 = vld [vmem:[#allocation6 + $0xd8] sm:$0xff] }
 0x183   :  { %2775 = vmatpush.msrb.mxu3 %v2706_v43 }
 0x184   :  { %2626 = vmatpush.bf16.msrb.mxu0 %v4111_v61  ;;  %2793 = vmatpush.msrb.mxu1 %v2727_v47  ;;  %v2719_v61 = vld [vmem:[#allocation6 + $0xa0] sm:$0xff] }
 0x186   :  { %2668 = vmatpush.bf16.msra.mxu2 %v3987_v57  ;;  %2794 = vmatpush.msrb.mxu1 %v2726_v49  ;;  %v2723_v57 = vld [vmem:[#allocation6 + $0xc0] sm:$0xff] }
 0x188   :  { %2627 = vmatpush.bf16.msrb.mxu0 %v4095_v5  ;;  %2795 = vmatpush.msrb.mxu1 %v2725_v52  ;;  %v2741_v5 = vld [vmem:[#allocation6 + $0x150] sm:$0xff] }
 0x18a   :  { %2669 = vmatpush.bf16.msra.mxu2 %v3971_v62  ;;  %2796 = vmatpush.msrb.mxu1 %v2724_v56  ;;  %v2744_v62 = vld [vmem:[#allocation6 + $0x168] sm:$0xff] }
 0x18c   :  { %2628 = vmatpush.bf16.msrb.mxu0 %v4079_v13  ;;  %2797 = vmatpush.msrb.mxu1 %v2723_v57  ;;  %v2715_v13 = vld [vmem:[#allocation6 + $0x80] sm:$0xff] }
 0x18e   :  { %2670 = vmatpush.bf16.msra.mxu2 %v3955_v3  ;;  %2798 = vmatpush.msrb.mxu1 %v2722_v37  ;;  %v2717_v3 = vld [vmem:[#allocation6 + $0x90] sm:$0xff]  ;;  %v2754_v37 = vld [vmem:[#allocation6 + $0x1b8] sm:$0xff] }
 0x18f   :  { %2629 = vmatmul.bf16.vlgmr.msrb.gmra.mxu0 %v4802_v33 }
 0x190   :  { %2677 = vmatpush.bf16.msra.mxu0 %v4195_v14  ;;  %2799 = vmatpush.msrb.mxu1 %v2721_v59  ;;  %v2739_v14 = vld [vmem:[#allocation6 + $0x140] sm:$0xff] }
 0x191   :  { %2671 = vmatmul.bf16.vlgmr.msra.gmra.mxu2 %v4796_v27  ;;  %v4497_v27 = vld [vmem:[#allocation4 + $0x34c] sm:$0xf] }
 0x192   :  { %v4115_v26 = vor.u32 %v4497_v27, %v4112_v4  ;;  %2813 = vmatpush.msrb.mxu2 %v2746_v58  ;;  %2800 = vmatpush.msrb.mxu1 %v2720_v42  ;;  %v2490_v63 = vpop.f32.mrf.mxu1 }
 0x194   :  { %2678 = vmatpush.bf16.msra.mxu0 %v4179_v16  ;;  %2814 = vmatpush.msrb.mxu2 %v2745_v40  ;;  %v1819_v16 = vperm.slane %v4813_v15, 0  ;;  %v2753_v40 = vld [vmem:[#allocation6 + $0x1b0] sm:$0xff] }
 0x195   :  { %2801 = vmatpush.msrb.mxu1 %v2719_v61 }
 0x196   :  { %2815 = vmatpush.msrb.mxu2 %v2744_v62  ;;  %v2477_v22 = vadd.f32 %v2476_v6, %v1819_v16  ;;  %v2752_v62 = vld [vmem:[#allocation6 + $0x1a8] sm:$0xff]  ;;  %v2750_v6 = vld [vmem:[#allocation6 + $0x198] sm:$0xff] }
 0x197   :  { %2802 = vmatpush.msrb.mxu1 %v2718_v1 }
 0x198   :  { %2679 = vmatpush.bf16.msra.mxu0 %v4163_v19  ;;  %2816 = vmatpush.msrb.mxu2 %v2743_v0  ;;  %v2736_v19 = vld [vmem:[#allocation6 + $0x128] sm:$0xff]  ;;  %v2491_v24 = vadd.f32 %v2490_v63, %v2477_v22  ;;  %v1821_v0 = vperm.slane %v4813_v15, 2 }
 0x199   :  { %2803 = vmatpush.msrb.mxu1 %v2717_v3 }
 0x19a   :  { %2817 = vmatpush.msrb.mxu2 %v2742_v2  ;;  %v2492_v18 = vpop.f32.mrf.mxu1  ;;  %v2751_v2 = vld [vmem:[#allocation6 + $0x1a0] sm:$0xff] }
 0x19b   :  { %2804 = vmatpush.msrb.mxu1 %v2716_v10 }
 0x19c   :  { %2680 = vmatpush.bf16.msra.mxu0 %v4147_v23  ;;  %2818 = vmatpush.msrb.mxu2 %v2741_v5  ;;  %v2478_v23 = vpop.f32.mrf.mxu3 }
 0x19d   :  { %2805 = vmatpush.msrb.mxu1 %v2715_v13  ;;  %v2479_v29 = vadd.f32 %v2478_v23, %v1819_v16  ;;  %v2749_v13 = vld [vmem:[#allocation6 + $0x190] sm:$0xff] }
 0x19e   :  { %2819 = vmatpush.msrb.mxu2 %v2740_v12 }
 0x19f   :  { %v2493_v45 = vadd.f32 %v2492_v18, %v2479_v29 }
 0x1a0   :  { %2681 = vmatpush.bf16.msra.mxu0 %v4131_v25  ;;  %2820 = vmatpush.msrb.mxu2 %v2739_v14  ;;  %v2734_v25 = vld [vmem:[#allocation6 + $0x118] sm:$0xff] }
 0x1a2   :  { %2821 = vmatpush.msrb.mxu2 %v2738_v35  ;;  %v2546_v34 = vpop.f32.mrf.mxu1  ;;  %v2748_v35 = vld [vmem:[#allocation6 + $0x188] sm:$0xff] }
 0x1a4   :  { %2682 = vmatpush.bf16.msra.mxu0 %v4115_v26  ;;  %2822 = vmatpush.msrb.mxu2 %v2737_v17  ;;  %v2733_v26 = vld [vmem:[#allocation6 + $0x110] sm:$0xff]  ;;  %v2532_v8 = vpop.f32.mrf.mxu3 }
 0x1a5   :  { %v2533_v46 = vadd.f32 %v2532_v8, %v1820_v39 }
 0x1a6   :  { %2823 = vmatpush.msrb.mxu2 %v2736_v19  ;;  %v2747_v19 = vld [vmem:[#allocation6 + $0x180] sm:$0xff] }
 0x1a7   :  { %v2547_v47 = vadd.f32 %v2546_v34, %v2533_v46 }
 0x1a8   :  { %2683 = vmatpush.bf16.msra.mxu0 %v4099_v21  ;;  %2824 = vmatpush.msrb.mxu2 %v2735_v20  ;;  %v2762_v21 = vld [vmem:[#allocation6 + $0x1f8] sm:$0xff] }
 0x1aa   :  { %2825 = vmatpush.msrb.mxu2 %v2734_v25 }
 0x1ac   :  { %2684 = vmatpush.bf16.msra.mxu0 %v4083_v31  ;;  %2826 = vmatpush.msrb.mxu2 %v2733_v26  ;;  %v2731_v31 = vld [vmem:[#allocation6 + $0x100] sm:$0xff]  ;;  %v2534_v49 = vpop.f32.mrf.mxu3 }
 0x1ad   :  { %v2535_v58 = vadd.f32 %v2534_v49, %v1820_v39 }
 0x1ae   :  { %2827 = vmatpush.msrb.mxu2 %v2732_v28 }
 0x1af   :  { %2685 = vmatmul.bf16.vlgmr.msra.gmra.mxu0 %v4802_v33  ;;  %v2705_v33 = vld [vmem:[#allocation6 + $0x30] sm:$0xff] }
 0x1b0   :  { %2776 = vmatpush.msrb.mxu3 %v2705_v33  ;;  %2836 = vmatpush.msrb.mxu0 %v2762_v21  ;;  %v1822_v21 = vperm.slane %v4813_v15, 3 }
 0x1b1   :  { %2828 = vmatpush.msrb.mxu2 %v2731_v31 }
 0x1b2   :  { %2777 = vmatpush.msrb.mxu3 %v2704_v9  ;;  %2837 = vmatpush.msrb.mxu0 %v2761_v32 }
 0x1b4   :  { %2778 = vmatpush.msrb.mxu3 %v2703_v7  ;;  %2838 = vmatpush.msrb.mxu0 %v2760_v36  ;;  %v2757_v7 = vld [vmem:[#allocation6 + $0x1d0] sm:$0xff] }
 0x1b6   :  { %2779 = vmatpush.msrb.mxu3 %v2702_v48  ;;  %2839 = vmatpush.msrb.mxu0 %v2759_v44  ;;  %v2756_v48 = vld [vmem:[#allocation6 + $0x1c8] sm:$0xff] }
 0x1b8   :  { %2780 = vmatpush.msrb.mxu3 %v2701_v51  ;;  %2840 = vmatpush.msrb.mxu0 %v2758_v54  ;;  %v2548_v51 = vpop.f32.mrf.mxu1 }
 0x1b9   :  { %v2549_v42 = vadd.f32 %v2548_v51, %v2535_v58 }
 0x1ba   :  { %2781 = vmatpush.msrb.mxu3 %v2700_v53  ;;  %2841 = vmatpush.msrb.mxu0 %v2757_v7  ;;  %v2755_v53 = vld [vmem:[#allocation6 + $0x1c0] sm:$0xff]  ;;  %v2588_v61 = vpop.f32.mrf.mxu3 }
 0x1bb   :  { %v2589_v10 = vadd.f32 %v2588_v61, %v1821_v0  ;;  %v4527_v7 = vld [vmem:[%s4840_s6] ss:$0 sm:$0xff] }
 0x1bc   :  { %2782 = vmatpush.msrb.mxu3 %v2699_v60  ;;  %2842 = vmatpush.msrb.mxu0 %v2756_v48  ;;  %v2859_v48 = vlaneseq }
 0x1be   :  { %2843 = vmatpush.msrb.mxu0 %v2755_v53 }
 0x1c0   :  { %2844 = vmatpush.msrb.mxu0 %v2754_v37  ;;  %v2602_v63 = vpop.f32.mrf.mxu1 }
 0x1c1   :  { %v2603_v14 = vadd.f32 %v2602_v63, %v2589_v10 }
 0x1c2   :  { %2845 = vmatpush.msrb.mxu0 %v2753_v40  ;;  %v2590_v17 = vpop.f32.mrf.mxu3 }
 0x1c3   :  { %v2591_v23 = vadd.f32 %v2590_v17, %v1821_v0 }
 0x1c4   :  { %2846 = vmatpush.msrb.mxu0 %v2752_v62 }
 0x1c6   :  { %2847 = vmatpush.msrb.mxu0 %v2751_v2 }
 0x1c8   :  { %2848 = vmatpush.msrb.mxu0 %v2750_v6  ;;  %v2604_v20 = vpop.f32.mrf.mxu1 }
 0x1c9   :  { %v2605_v25 = vadd.f32 %v2604_v20, %v2591_v23 }
 0x1ca   :  { %2849 = vmatpush.msrb.mxu0 %v2749_v13 }
 0x1cc   :  { %2850 = vmatpush.msrb.mxu0 %v2748_v35 }
 0x1ce   :  { %v2504_v11 = vpop.f32.mrf.mxu2  ;;  %2851 = vmatpush.msrb.mxu0 %v2747_v19 }
 0x1cf   :  { %v2505_v27 = vadd.f32 %v2504_v11, %v2491_v24 }
 0x1d5   :  { %v2658_v29 = vpop.f32.mrf.mxu1 }
 0x1d6   :  { %v2506_v55 = vpop.f32.mrf.mxu2 }
 0x1d7   :  { %v2507_v41 = vadd.f32 %v2506_v55, %v2493_v45 }
 0x1da   :  { %v2644_v28 = vpop.f32.mrf.mxu3 }
 0x1db   :  { %v2645_v31 = vadd.f32 %v2644_v28, %v1822_v21 }
 0x1dd   :  { %v2659_v32 = vadd.f32 %v2658_v29, %v2645_v31 }
 0x1de   :  { %v2560_v38 = vpop.f32.mrf.mxu2 }
 0x1df   :  { %v2561_v52 = vadd.f32 %v2560_v38, %v2547_v47  ;;  %v2660_v38 = vpop.f32.mrf.mxu1 }
 0x1e2   :  { %v2646_v34 = vpop.f32.mrf.mxu3 }
 0x1e3   :  { %v2647_v39 = vadd.f32 %v2646_v34, %v1822_v21 }
 0x1e5   :  { %v2661_v44 = vadd.f32 %v2660_v38, %v2647_v39 }
 0x1e6   :  { %v2562_v56 = vpop.f32.mrf.mxu2 }
 0x1e7   :  { %v2563_v1 = vadd.f32 %v2562_v56, %v2549_v42 }
 0x1ec   :  { %v2518_v4 = vpop.f32.mrf.mxu0 }
 0x1ed   :  { %v2519_v50 = vadd.f32 %v2518_v4, %v2505_v27 }
 0x1ef   :  { %v2691_v30 = vmax.f32 %v2519_v50, 0.0 }
 0x1f1   :  { %2783 = vmatmul.f32.vlgmr.msrb.gmra.mxu3 %v2691_v30 }
 0x1f4   :  { %v2520_v43 = vpop.f32.mrf.mxu0  ;;  %v2616_v11 = vpop.f32.mrf.mxu2 }
 0x1f5   :  { %v2521_v33 = vadd.f32 %v2520_v43, %v2507_v41  ;;  %v2617_v16 = vadd.f32 %v2616_v11, %v2603_v14 }
 0x1f7   :  { %v2695_v9 = vmax.f32 %v2521_v33, 0.0 }
 0x1f9   :  { %2786 = vmatmul.f32.gmra.mxu3 %v2695_v9 }
 0x1fc   :  { %v2574_v60 = vpop.f32.mrf.mxu0  ;;  %v2618_v24 = vpop.f32.mrf.mxu2 }
 0x1fd   :  { %v2575_v57 = vadd.f32 %v2574_v60, %v2561_v52  ;;  %v2619_v27 = vadd.f32 %v2618_v24, %v2605_v25  ;;  %v2860_v52 = vand.u32 127, %v2859_v48 }
 0x1ff   :  { %v2692_v59 = vmax.f32 %v2575_v57, 0.0  ;;  %vm2861_vm1 = vcmp.lt.s32.totalorder %v2860_v52, 10 }
 0x201   :  { %2806 = vmatmul.f32.vlgmr.msrb.gmra.mxu1 %v2692_v59 }
 0x204   :  { %v2576_v3 = vpop.f32.mrf.mxu0 }
 0x205   :  { %v2577_v5 = vadd.f32 %v2576_v3, %v2563_v1 }
 0x207   :  { %v2696_v12 = vmax.f32 %v2577_v5, 0.0 }
 0x209   :  { %2809 = vmatmul.f32.gmra.mxu1 %v2696_v12 }
 0x20c   :  { %v2630_v18 = vpop.f32.mrf.mxu0 }
 0x20d   :  { %v2631_v22 = vadd.f32 %v2630_v18, %v2617_v16 }
 0x20f   :  { %v2693_v55 = vmax.f32 %v2631_v22, 0.0 }
 0x211   :  { %2829 = vmatmul.f32.vlgmr.msrb.gmra.mxu2 %v2693_v55 }
 0x214   :  { %v2632_v4 = vpop.f32.mrf.mxu0  ;;  %v2672_v30 = vpop.f32.mrf.mxu2 }
 0x215   :  { %v2633_v26 = vadd.f32 %v2632_v4, %v2619_v27  ;;  %v2673_v8 = vadd.f32 %v2672_v30, %v2659_v32 }
 0x217   :  { %v2697_v50 = vmax.f32 %v2633_v26, 0.0 }
 0x219   :  { %2832 = vmatmul.f32.gmra.mxu2 %v2697_v50 }
 0x21c   :  { %v2674_v43 = vpop.f32.mrf.mxu2 }
 0x21d   :  { %v2675_v33 = vadd.f32 %v2674_v43, %v2661_v44 }
 0x22c   :  { %v2686_v45 = vpop.f32.mrf.mxu0 }
 0x22d   :  { %v2687_v36 = vadd.f32 %v2686_v45, %v2673_v8 }
 0x22f   :  { %v2694_v41 = vmax.f32 %v2687_v36, 0.0 }
 0x231   :  { %2852 = vmatmul.f32.vlgmr.msrb.gmra.mxu0 %v2694_v41 }
 0x234   :  { %v2688_v54 = vpop.f32.mrf.mxu0 }
 0x235   :  { %v2689_v46 = vadd.f32 %v2688_v54, %v2675_v33 }
 0x237   :  { %v2698_v9 = vmax.f32 %v2689_v46, 0.0 }
 0x239   :  { %2855 = vmatmul.f32.gmra.mxu0 %v2698_v9 }
 0x274   :  { %v2784_v15 = vpop.f32.mrf.mxu3 }
 0x275   :  { %v2785_v51 = vadd.f32 %v4527_v7, %v2784_v15 }
 0x27c   :  { %v2787_v60 = vpop.f32.mrf.mxu3 }
 0x27d   :  { %v2788_v59 = vadd.f32 %v4527_v7, %v2787_v60 }
 0x27e   :  { %v2807_v47 = vpop.f32.mrf.mxu1 }
 0x27f   :  { %v2808_v53 = vadd.f32 %v2807_v47, %v2785_v51 }
 0x286   :  { %v2810_v58 = vpop.f32.mrf.mxu1 }
 0x287   :  { %v2811_v62 = vadd.f32 %v2810_v58, %v2788_v59 }
 0x294   :  { %v2830_v49 = vpop.f32.mrf.mxu2 }
 0x295   :  { %v2831_v56 = vadd.f32 %v2830_v49, %v2808_v53 }
 0x29c   :  { %v2833_v42 = vpop.f32.mrf.mxu2 }
 0x29d   :  { %v2834_v61 = vadd.f32 %v2833_v42, %v2811_v62 }
 0x2ae   :  { %v2853_v57 = vpop.f32.mrf.mxu0 }
 0x2af   :  { %v2854_v37 = vadd.f32 %v2853_v57, %v2831_v56 }
 0x2b1   :  { %v2862_v40 = vsel %vm2861_vm1, %v2854_v37, -1e+30 }
 0x2b2   :  { %2864 = vmax.xlane.f32.xlu0 %v2862_v40 }
 0x2b6   :  { %v2856_v0 = vpop.f32.mrf.mxu0 }
 0x2b7   :  { %v2857_v1 = vadd.f32 %v2856_v0, %v2834_v61 }
 0x2b9   :  { %v2863_v2 = vsel %vm2861_vm1, %v2857_v1, -1e+30 }
 0x2ba   :  { %2866 = vmax.xlane.f32.xlu0 %v2863_v2 }
 0x325   :  { %v2865_v63 = vpop.xlane.xlu0 %2864 }
 0x326   :  { %v2868_v3 = vsub.f32 %v2854_v37, %v2865_v63 }
 0x328   :  { %v2870_v5 = vmul.f32 1.442695, %v2868_v3 }
 0x32a   :  { %4528 = vpow2.f32 %v2870_v5 }
 0x32d   :  { %v2867_v6 = vpop.xlane.xlu0 %2866 }
 0x32e   :  { %v2869_v11 = vsub.f32 %v2857_v1, %v2867_v6 }
 0x330   :  { %v4529_v10 = vpop.eup %4528  ;;  %v2872_v12 = vmul.f32 1.442695, %v2869_v11 }
 0x331   :  { %v2874_v13 = vsel %vm2861_vm1, %v4529_v10, 0.0 }
 0x332   :  { %4530 = vpow2.f32 %v2872_v12  ;;  %2876 = vadd.xlane.f32.xlu1 %v2874_v13 }
 0x338   :  { %v4531_v14 = vpop.eup %4530 }
 0x339   :  { %v2875_v35 = vsel %vm2861_vm1, %v4531_v14, 0.0 }
 0x33a   :  { %2878 = vadd.xlane.f32.xlu1 %v2875_v35 }
 0x3a5   :  { %v2877_v16 = vpop.xlane.xlu1 %2876 }
 0x3a6   :  { %4532 = vlog2.f32 %v2877_v16 }
 0x3ac   :  { %v4533_v17 = vpop.eup %4532 }
 0x3ad   :  { %v2881_v18 = vmul.f32 0.6931472, %v4533_v17  ;;  %v2879_v19 = vpop.xlane.xlu1 %2878 }
 0x3ae   :  { %4534 = vlog2.f32 %v2879_v19 }
 0x3af   :  { %v2884_v22 = vsub.f32 %v2868_v3, %v2881_v18 }
 0x3b1   :  { %v2886_v20 = vsel %vm2861_vm1, %v2884_v22, 0.0 }
 0x3b2   :  { %2888 = vst [vmem:[%s4841_s7] sm:$0xff] %v2886_v20 }
 0x3b4   :  { %v4535_v23 = vpop.eup %4534 }
 0x3b5   :  { %v2883_v55 = vmul.f32 0.6931472, %v4535_v23 }
 0x3b7   :  { %v2885_v24 = vsub.f32 %v2869_v11, %v2883_v55 }
 0x3b9   :  { %v2887_v25 = vsel %vm2861_vm1, %v2885_v24, 0.0 }
 0x3ba   :  { %2889 = vst [vmem:[%s4841_s7 + $0x8] sm:$0xff] %v2887_v25 }
 0x3bb   :  { %2894 = vsyncpa [#allocation3], 1 }
 0x3bc   :  { %2895 = vsyncpa [#allocation5], 1 }

</bundles_post_ra>
